<compile_context>
chip_gen: v7x
topology: tpu7x:2x2x1
jax: 0.10.0
libtpu: 0.0.40
codegen_flags: <defaults>
</compile_context>

<pallas_src>
import functools

import jax
import jax.numpy as jnp
from jax.experimental import pallas as pl
from jax.experimental.pallas import tpu as pltpu


def _round_up(x, m):
    return (x + m - 1) // m * m


# ---------------------------------------------------------------------------
# Kernel 1: fully parallel matmul + bias (used for gates_x = X @ W_ih + b).
# ---------------------------------------------------------------------------
def dkt_matmul_bias_kernel(x_ref, w_ref, b_ref, out_ref):
    out_ref[...] = (
        jnp.dot(x_ref[...], w_ref[...], preferred_element_type=jnp.float32)
        + b_ref[...]
    )


# ---------------------------------------------------------------------------
# Kernel 2: LSTM recurrence.  Grid = (batch tile [parallel], time block [arbitrary]).
# Only the hidden->gate matmul runs on the serial path; the input projection is
# precomputed (gx_ref).  h/c persist in VMEM scratch across time blocks.
# ---------------------------------------------------------------------------
def dkt_lstm_kernel(gx_ref, whh_ref, hid_ref, h_scr, c_scr, hid_scr):
    ti = pl.program_id(1)

    @pl.when(ti == 0)
    def _():
        h_scr[...] = jnp.zeros_like(h_scr)
        c_scr[...] = jnp.zeros_like(c_scr)

    TB = gx_ref.shape[0]
    Hp = h_scr.shape[-1]

    # Fully unrolled inner time loop (TB is a small static constant); all gate
    # slices are static and lane-aligned.
    for s in range(TB):
        # gates = (x_t @ W_ih + b) + h_{t-1} @ W_hh   (PyTorch gate order [i|f|g|o])
        gates = gx_ref[s] + jnp.dot(
            h_scr[...], whh_ref[...], preferred_element_type=jnp.float32
        )  # (BT, 4Hp) f32

        # sigmoid(x) == 0.5*tanh(0.5*x)+0.5 : one EUP op per gate instead of
        # exp+reciprocal; the extra mul/add rides on idle VALU slots.
        i_g = 0.5 * jnp.tanh(0.5 * gates[:, 0 * Hp:1 * Hp]) + 0.5
        f_g = 0.5 * jnp.tanh(0.5 * gates[:, 1 * Hp:2 * Hp]) + 0.5
        g_g = jnp.tanh(gates[:, 2 * Hp:3 * Hp])
        o_g = 0.5 * jnp.tanh(0.5 * gates[:, 3 * Hp:4 * Hp]) + 0.5

        c_new = f_g * c_scr[...] + i_g * g_g
        h_new = o_g * jnp.tanh(c_new)

        c_scr[...] = c_new                      # f32 accumulator state
        h_scr[...] = h_new.astype(h_scr.dtype)  # bf16 state feeds next matmul
        hid_scr[s] = h_new                      # dense (BT, Hp) plane store

    # One transposed copy per block: (TB, BT, Hp) -> (BT, TB, Hp) batch-first tile.
    hid_ref[...] = pltpu.einshape("tbh->bth", hid_scr[...]).astype(hid_ref.dtype)


# ---------------------------------------------------------------------------
# Kernel 3: output projection + sigmoid over tiles of (B*T) rows x Pp columns.
# ---------------------------------------------------------------------------
def dkt_fc_kernel(h_ref, w_ref, b_ref, out_ref):
    logits = (
        jnp.dot(h_ref[...], w_ref[...], preferred_element_type=jnp.float32)
        + b_ref[...]
    )
    out_ref[...] = jax.nn.sigmoid(logits)


# ---------------------------------------------------------------------------
# Parameter init (mirrors PyTorch defaults; weights pre-transposed to x @ W).
# ---------------------------------------------------------------------------
def init_dkt_params(key, num_problems, emb_size, hidden_size):
    kE, k1, k2, k3, k4, k5, k6 = jax.random.split(key, 7)
    H, E, P = hidden_size, emb_size, num_problems
    s_lstm = 1.0 / jnp.sqrt(H)
    s_fc = 1.0 / jnp.sqrt(H)

    emb = jax.random.normal(kE, (2 * P, E), jnp.float32)
    emb = emb.at[0].set(0.0)  # padding_idx=0

    w_ih = jax.random.uniform(k1, (E, 4 * H), jnp.float32, -s_lstm, s_lstm)
    w_hh = jax.random.uniform(k2, (H, 4 * H), jnp.float32, -s_lstm, s_lstm)
    b_ih = jax.random.uniform(k3, (4 * H,), jnp.float32, -s_lstm, s_lstm)
    b_hh = jax.random.uniform(k4, (4 * H,), jnp.float32, -s_lstm, s_lstm)
    b = (b_ih + b_hh).reshape(1, 4 * H)

    w_fc = jax.random.uniform(k5, (H, P), jnp.float32, -s_fc, s_fc)
    b_fc = jax.random.uniform(k6, (1, P), jnp.float32, -s_fc, s_fc)

    return {"embedding": emb, "w_ih": w_ih, "w_hh": w_hh, "b": b,
            "w_fc": w_fc, "b_fc": b_fc}


# ---------------------------------------------------------------------------
# Forward wrapper.
# ---------------------------------------------------------------------------
def dkt_forward(problem_seqs, answer_seqs, params, num_problems):
    emb = params["embedding"]
    w_ih, w_hh, b = params["w_ih"], params["w_hh"], params["b"]
    w_fc, b_fc = params["w_fc"], params["b_fc"]

    B, T = problem_seqs.shape
    E = emb.shape[1]
    H = w_hh.shape[0]
    P = w_fc.shape[1]

    # ---- tile-size selection -------------------------------------------------
    TB = min(32, _round_up(T, 8))           # timesteps per grid step (sweepable 8..32)
    Tp = _round_up(T, TB)

    B8 = _round_up(B, 8)
    if B8 >= 256:
        BT = 128                            # saturate the MXU M dimension
    elif B8 >= 16:
        BT = _round_up(B8, 16) // 2         # >= 2 parallel tiles (keeps v7x's 2nd TC busy)
    else:
        BT = 8                              # can't split below one sublane group
    Bp = _round_up(B8, BT)                  # BT always divides Bp (fixes B=65-style bug)

    Ep = _round_up(E, 128)                  # lane-aligned embedding
    Hp = _round_up(H, 128)                  # lane-aligned hidden (aligned gate slices)
    Pp = _round_up(P, 128)                  # lane-dense output stores

    # ---- glue: index combine + bf16 embedding gather -> time-major x ---------
    idx = problem_seqs + num_problems * answer_seqs              # (B, T) int32
    emb_bf16 = emb.astype(jnp.bfloat16)                          # halve gather traffic
    x_tbe = emb_bf16[idx.T]                                      # (T, B, E) bf16, time-major
    x = jnp.pad(x_tbe, ((0, Tp - T), (0, Bp - B), (0, Ep - E)))  # (Tp, Bp, Ep)
    x2d = x.reshape(Tp * Bp, Ep)                                 # contiguous, time-major rows

    # ---- pad LSTM weights, gate-blocked columns [i | f | g | o] ---------------
    w_ih_p = jnp.zeros((Ep, 4 * Hp), jnp.float32)
    w_hh_p = jnp.zeros((Hp, 4 * Hp), jnp.float32)
    b_p = jnp.zeros((1, 4 * Hp), jnp.float32)
    for k in range(4):
        w_ih_p = w_ih_p.at[:E, k * Hp:k * Hp + H].set(w_ih[:, k * H:(k + 1) * H])
        w_hh_p = w_hh_p.at[:H, k * Hp:k * Hp + H].set(w_hh[:, k * H:(k + 1) * H])
        b_p = b_p.at[:, k * Hp:k * Hp + H].set(b[:, k * H:(k + 1) * H])
    w_ih_p = w_ih_p.astype(jnp.bfloat16)
    w_hh_p = w_hh_p.astype(jnp.bfloat16)

    # ---- kernel 1: gates_x = X @ W_ih + b for all (T, B) rows, fully parallel -
    rows_x = Tp * Bp
    TMx = min(512, rows_x)
    rows_xp = _round_up(rows_x, TMx)
    if rows_xp != rows_x:
        x2d = jnp.pad(x2d, ((0, rows_xp - rows_x), (0, 0)))

    gates_x = pl.pallas_call(
        dkt_matmul_bias_kernel,
        out_shape=jax.ShapeDtypeStruct((rows_xp, 4 * Hp), jnp.float32),
        grid_spec=pltpu.PrefetchScalarGridSpec(
            num_scalar_prefetch=0,
            grid=(rows_xp // TMx,),
            in_specs=[
                pl.BlockSpec((TMx, Ep), lambda i: (i, 0)),
                pl.BlockSpec((Ep, 4 * Hp), lambda i: (0, 0)),   # W_ih (resident)
                pl.BlockSpec((1, 4 * Hp), lambda i: (0, 0)),    # b_ih + b_hh
            ],
            out_specs=pl.BlockSpec((TMx, 4 * Hp), lambda i: (i, 0)),
        ),
        compiler_params=pltpu.CompilerParams(
            dimension_semantics=("parallel",),
            vmem_limit_bytes=32 * 1024 * 1024,
        ),
    )(x2d, w_ih_p, b_p)
    gates_x = gates_x[:rows_x].reshape(Tp, Bp, 4 * Hp)           # time-major gate blocks

    # ---- kernel 2: LSTM recurrence (batch tiles parallel, time blocks serial) -
    hidden = pl.pallas_call(
        dkt_lstm_kernel,
        out_shape=jax.ShapeDtypeStruct((Bp, Tp, Hp), jnp.bfloat16),
        grid_spec=pltpu.PrefetchScalarGridSpec(
            num_scalar_prefetch=0,
            grid=(Bp // BT, Tp // TB),
            in_specs=[
                pl.BlockSpec((TB, BT, 4 * Hp), lambda bi, ti: (ti, bi, 0)),  # gates_x block
                pl.BlockSpec((Hp, 4 * Hp), lambda bi, ti: (0, 0)),           # W_hh (resident)
            ],
            out_specs=pl.BlockSpec((BT, TB, Hp), lambda bi, ti: (bi, ti, 0)),  # batch-first h
            scratch_shapes=[
                pltpu.VMEM((BT, Hp), jnp.bfloat16),       # h state (bf16 feeds MXU)
                pltpu.VMEM((BT, Hp), jnp.float32),        # c state (f32 accumulator)
                pltpu.VMEM((TB, BT, Hp), jnp.float32),    # dense per-step h staging
            ],
        ),
        compiler_params=pltpu.CompilerParams(
            dimension_semantics=("parallel", "arbitrary"),
            vmem_limit_bytes=48 * 1024 * 1024,
        ),
    )(gates_x, w_hh_p)

    # ---- kernel 3: FC + sigmoid over all rows, row- and Pp-tiled --------------
    if Pp > 2048:                            # tile N for large num_problems (v7x VMEM)
        TN = 2048
        Pp = _round_up(Pp, TN)
    else:
        TN = Pp

    w_fc_p = jnp.zeros((Hp, Pp), jnp.bfloat16).at[:H, :P].set(w_fc.astype(jnp.bfloat16))
    b_fc_p = jnp.zeros((1, Pp), jnp.float32).at[:, :P].set(b_fc)

    rows = Bp * Tp
    hid2d = hidden.reshape(rows, Hp)         # contiguous reshape, batch-first rows
    TM = min(512, rows)
    rows_p = _round_up(rows, TM)
    if rows_p != rows:
        hid2d = jnp.pad(hid2d, ((0, rows_p - rows), (0, 0)))

    out = pl.pallas_call(
        dkt_fc_kernel,
        out_shape=jax.ShapeDtypeStruct((rows_p, Pp), jnp.float32),
        grid_spec=pltpu.PrefetchScalarGridSpec(
            num_scalar_prefetch=0,
            grid=(rows_p // TM, Pp // TN),
            in_specs=[
                pl.BlockSpec((TM, Hp), lambda i, j: (i, 0)),     # hidden rows
                pl.BlockSpec((Hp, TN), lambda i, j: (0, j)),     # W_fc column tile
                pl.BlockSpec((1, TN), lambda i, j: (0, j)),      # b_fc column tile
            ],
            out_specs=pl.BlockSpec((TM, TN), lambda i, j: (i, j)),
        ),
        compiler_params=pltpu.CompilerParams(
            dimension_semantics=("parallel", "parallel"),
            vmem_limit_bytes=32 * 1024 * 1024,
        ),
    )(hid2d, w_fc_p, b_fc_p)

    # strip row / batch / time / problem padding -> (B, T, num_problems)
    return out[:rows].reshape(Bp, Tp, Pp)[:B, :T, :P]


if __name__ == "__main__":
    num_problems = 16
    emb_size = 32
    hidden_size = 32
    batch = 2
    seq = 8

    key = jax.random.PRNGKey(0)
    kp, ka, kw = jax.random.split(key, 3)

    problem_seqs = jax.random.randint(kp, (batch, seq), 0, num_problems, jnp.int32)
    answer_seqs = jax.random.randint(ka, (batch, seq), 0, 2, jnp.int32)
    params = init_dkt_params(kw, num_problems, emb_size, hidden_size)

    fwd = jax.jit(functools.partial(dkt_forward, num_problems=num_problems))
    out = fwd(problem_seqs, answer_seqs, params)
    jax.block_until_ready(out)

    assert out.shape == (batch, seq, num_problems)
    assert bool(jnp.all(jnp.isfinite(out)))
    assert bool(jnp.all((out >= 0.0) & (out <= 1.0)))
    print("KERNEL_OK")
</pallas_src>

<mosaic_0001>
module attributes {stable_mosaic.version = 11 : i64} {
  func.func @dkt_matmul_bias_kernel(%arg0: i32, %arg1: memref<64x128xbf16, #tpu.memory_space<vmem>>, %arg2: memref<128x512xbf16, #tpu.memory_space<vmem>>, %arg3: memref<1x512xf32, #tpu.memory_space<vmem>>, %arg4: memref<64x512xf32, #tpu.memory_space<vmem>>) attributes {dimension_semantics = [#tpu.dimension_semantics<parallel>], iteration_bounds = array<i64: 1>, scalar_prefetch = 0 : i64, scratch_operands = 0 : i64, tpu.core_type = #tpu.core_type<tc>, window_params = [{transform_indices = @transform_0, window_bounds = array<i64: 64, 128>}, {pipeline_mode = #tpu.pipeline_mode<synchronous>, transform_indices = @transform_1, window_bounds = array<i64: 128, 512>}, {pipeline_mode = #tpu.pipeline_mode<synchronous>, transform_indices = @transform_2, window_bounds = array<i64: 1, 512>}, {transform_indices = @transform_3, window_bounds = array<i64: 64, 512>}]} {
    %c0 = arith.constant 0 : index
    %c0_0 = arith.constant 0 : index
    %0 = vector.load %arg1[%c0, %c0_0] : memref<64x128xbf16, #tpu.memory_space<vmem>>, vector<64x128xbf16>
    %c0_1 = arith.constant 0 : index
    %c0_2 = arith.constant 0 : index
    %1 = vector.load %arg2[%c0_1, %c0_2] : memref<128x512xbf16, #tpu.memory_space<vmem>>, vector<128x512xbf16>
    %cst = arith.constant dense<0.000000e+00> : vector<64x512xf32>
    %2 = tpu.matmul %0, %1, %cst {dimension_numbers = #tpu.dot_dimension_numbers<[1], [0], [0], [1], [0, 0, 1, 1], [], []>} : vector<64x128xbf16>, vector<128x512xbf16>, vector<64x512xf32> -> vector<64x512xf32>
    %c0_3 = arith.constant 0 : index
    %c0_4 = arith.constant 0 : index
    %3 = vector.load %arg3[%c0_3, %c0_4] : memref<1x512xf32, #tpu.memory_space<vmem>>, vector<1x512xf32>
    %4 = vector.broadcast %3 : vector<1x512xf32> to vector<64x512xf32>
    %5 = arith.addf %2, %4 : vector<64x512xf32>
    %c0_5 = arith.constant 0 : index
    %c0_6 = arith.constant 0 : index
    %6 = vector.load %arg4[%c0_5, %c0_6] : memref<64x512xf32, #tpu.memory_space<vmem>>, vector<64x512xf32>
    tpu.vector_store %arg4[%c0_5, %c0_6], %5 {strides = array<i32>} : memref<64x512xf32, #tpu.memory_space<vmem>>, vector<64x512xf32>,
    return
  }
  func.func @transform_0(%arg0: i32) -> (i32, i32) {
    %c0_i32 = arith.constant 0 : i32
    %c0_i32_0 = arith.constant 0 : i32
    return %arg0, %c0_i32 : i32, i32
  }
  func.func @transform_1(%arg0: i32) -> (i32, i32) {
    %c0_i32 = arith.constant 0 : i32
    %c0_i32_0 = arith.constant 0 : i32
    %c0_i32_1 = arith.constant 0 : i32
    return %c0_i32, %c0_i32_0 : i32, i32
  }
  func.func @transform_2(%arg0: i32) -> (i32, i32) {
    %c0_i32 = arith.constant 0 : i32
    %c0_i32_0 = arith.constant 0 : i32
    %c0_i32_1 = arith.constant 0 : i32
    return %c0_i32, %c0_i32_0 : i32, i32
  }
  func.func @transform_3(%arg0: i32) -> (i32, i32) {
    %c0_i32 = arith.constant 0 : i32
    %c0_i32_0 = arith.constant 0 : i32
    return %arg0, %c0_i32 : i32, i32
  }
}

module attributes {stable_mosaic.version = 11 : i64} {
  func.func @dkt_lstm_kernel(%arg0: i32, %arg1: i32, %arg2: memref<8x8x512xf32, #tpu.memory_space<vmem>>, %arg3: memref<128x512xbf16, #tpu.memory_space<vmem>>, %arg4: memref<8x8x128xbf16, #tpu.memory_space<vmem>>, %arg5: memref<8x128xbf16, #tpu.memory_space<vmem>>, %arg6: memref<8x128xf32, #tpu.memory_space<vmem>>, %arg7: memref<8x8x128xf32, #tpu.memory_space<vmem>>) attributes {dimension_semantics = [#tpu.dimension_semantics<parallel>, #tpu.dimension_semantics<arbitrary>], iteration_bounds = array<i64: 1, 1>, scalar_prefetch = 0 : i64, scratch_operands = 3 : i64, tpu.core_type = #tpu.core_type<tc>, window_params = [{transform_indices = @transform_0, window_bounds = array<i64: 8, 8, 512>}, {pipeline_mode = #tpu.pipeline_mode<synchronous>, transform_indices = @transform_1, window_bounds = array<i64: 128, 512>}, {transform_indices = @transform_2, window_bounds = array<i64: 8, 8, 128>}]} {
    %c0_i32 = arith.constant 0 : i32
    %0 = arith.cmpi eq, %arg1, %c0_i32 : i32
    %1 = arith.extui %0 : i1 to i32
    %c0_i32_0 = arith.constant 0 : i32
    %2 = arith.cmpi ne, %1, %c0_i32_0 : i32
    scf.if %2 {
      %cst_206 = arith.constant 0.000000e+00 : bf16
      %359 = vector.broadcast %cst_206 : bf16 to vector<8x128xbf16>
      %c0_207 = arith.constant 0 : index
      %c0_208 = arith.constant 0 : index
      %360 = vector.load %arg5[%c0_207, %c0_208] : memref<8x128xbf16, #tpu.memory_space<vmem>>, vector<8x128xbf16>
      tpu.vector_store %arg5[%c0_207, %c0_208], %359 {strides = array<i32>} : memref<8x128xbf16, #tpu.memory_space<vmem>>, vector<8x128xbf16>,
      %cst_209 = arith.constant 0.000000e+00 : f32
      %361 = vector.broadcast %cst_209 : f32 to vector<8x128xf32>
      %c0_210 = arith.constant 0 : index
      %c0_211 = arith.constant 0 : index
      %362 = vector.load %arg6[%c0_210, %c0_211] : memref<8x128xf32, #tpu.memory_space<vmem>>, vector<8x128xf32>
      tpu.vector_store %arg6[%c0_210, %c0_211], %361 {strides = array<i32>} : memref<8x128xf32, #tpu.memory_space<vmem>>, vector<8x128xf32>,
    } else {
    }
    %c0 = arith.constant 0 : index
    %c0_1 = arith.constant 0 : index
    %c0_2 = arith.constant 0 : index
    %3 = vector.load %arg2[%c0, %c0_1, %c0_2] : memref<8x8x512xf32, #tpu.memory_space<vmem>>, vector<1x8x512xf32>
    %4 = vector.shape_cast %3 : vector<1x8x512xf32> to vector<8x512xf32>
    %c0_3 = arith.constant 0 : index
    %c0_4 = arith.constant 0 : index
    %5 = vector.load %arg5[%c0_3, %c0_4] : memref<8x128xbf16, #tpu.memory_space<vmem>>, vector<8x128xbf16>
    %c0_5 = arith.constant 0 : index
    %c0_6 = arith.constant 0 : index
    %6 = vector.load %arg3[%c0_5, %c0_6] : memref<128x512xbf16, #tpu.memory_space<vmem>>, vector<128x512xbf16>
    %cst = arith.constant dense<0.000000e+00> : vector<8x512xf32>
    %7 = tpu.matmul %5, %6, %cst {dimension_numbers = #tpu.dot_dimension_numbers<[1], [0], [0], [1], [0, 0, 1, 1], [], []>} : vector<8x128xbf16>, vector<128x512xbf16>, vector<8x512xf32> -> vector<8x512xf32>
    %8 = arith.addf %4, %7 : vector<8x512xf32>
    %9 = vector.extract_strided_slice %8 {offsets = [0, 0], sizes = [8, 128], strides = [1, 1]} : vector<8x512xf32> to vector<8x128xf32>
    %cst_7 = arith.constant 5.000000e-01 : f32
    %10 = vector.broadcast %cst_7 : f32 to vector<8x128xf32>
    %11 = arith.mulf %10, %9 : vector<8x128xf32>
    %12 = math.tanh %11 : vector<8x128xf32>
    %cst_8 = arith.constant 5.000000e-01 : f32
    %13 = vector.broadcast %cst_8 : f32 to vector<8x128xf32>
    %14 = arith.mulf %13, %12 : vector<8x128xf32>
    %cst_9 = arith.constant 5.000000e-01 : f32
    %15 = vector.broadcast %cst_9 : f32 to vector<8x128xf32>
    %16 = arith.addf %14, %15 : vector<8x128xf32>
    %17 = vector.extract_strided_slice %8 {offsets = [0, 128], sizes = [8, 128], strides = [1, 1]} : vector<8x512xf32> to vector<8x128xf32>
    %cst_10 = arith.constant 5.000000e-01 : f32
    %18 = vector.broadcast %cst_10 : f32 to vector<8x128xf32>
    %19 = arith.mulf %18, %17 : vector<8x128xf32>
    %20 = math.tanh %19 : vector<8x128xf32>
    %cst_11 = arith.constant 5.000000e-01 : f32
    %21 = vector.broadcast %cst_11 : f32 to vector<8x128xf32>
    %22 = arith.mulf %21, %20 : vector<8x128xf32>
    %cst_12 = arith.constant 5.000000e-01 : f32
    %23 = vector.broadcast %cst_12 : f32 to vector<8x128xf32>
    %24 = arith.addf %22, %23 : vector<8x128xf32>
    %25 = vector.extract_strided_slice %8 {offsets = [0, 256], sizes = [8, 128], strides = [1, 1]} : vector<8x512xf32> to vector<8x128xf32>
    %26 = math.tanh %25 : vector<8x128xf32>
    %27 = vector.extract_strided_slice %8 {offsets = [0, 384], sizes = [8, 128], strides = [1, 1]} : vector<8x512xf32> to vector<8x128xf32>
    %cst_13 = arith.constant 5.000000e-01 : f32
    %28 = vector.broadcast %cst_13 : f32 to vector<8x128xf32>
    %29 = arith.mulf %28, %27 : vector<8x128xf32>
    %30 = math.tanh %29 : vector<8x128xf32>
    %cst_14 = arith.constant 5.000000e-01 : f32
    %31 = vector.broadcast %cst_14 : f32 to vector<8x128xf32>
    %32 = arith.mulf %31, %30 : vector<8x128xf32>
    %cst_15 = arith.constant 5.000000e-01 : f32
    %33 = vector.broadcast %cst_15 : f32 to vector<8x128xf32>
    %34 = arith.addf %32, %33 : vector<8x128xf32>
    %c0_16 = arith.constant 0 : index
    %c0_17 = arith.constant 0 : index
    %35 = vector.load %arg6[%c0_16, %c0_17] : memref<8x128xf32, #tpu.memory_space<vmem>>, vector<8x128xf32>
    %36 = arith.mulf %24, %35 : vector<8x128xf32>
    %37 = arith.mulf %16, %26 : vector<8x128xf32>
    %38 = arith.addf %36, %37 : vector<8x128xf32>
    %39 = math.tanh %38 : vector<8x128xf32>
    %40 = arith.mulf %34, %39 : vector<8x128xf32>
    %c0_18 = arith.constant 0 : index
    %c0_19 = arith.constant 0 : index
    %41 = vector.load %arg6[%c0_18, %c0_19] : memref<8x128xf32, #tpu.memory_space<vmem>>, vector<8x128xf32>
    tpu.vector_store %arg6[%c0_18, %c0_19], %38 {strides = array<i32>} : memref<8x128xf32, #tpu.memory_space<vmem>>, vector<8x128xf32>,
    %42 = arith.truncf %40 : vector<8x128xf32> to vector<8x128xbf16>
    %c0_20 = arith.constant 0 : index
    %c0_21 = arith.constant 0 : index
    %43 = vector.load %arg5[%c0_20, %c0_21] : memref<8x128xbf16, #tpu.memory_space<vmem>>, vector<8x128xbf16>
    tpu.vector_store %arg5[%c0_20, %c0_21], %42 {strides = array<i32>} : memref<8x128xbf16, #tpu.memory_space<vmem>>, vector<8x128xbf16>,
    %c0_22 = arith.constant 0 : index
    %c0_23 = arith.constant 0 : index
    %c0_24 = arith.constant 0 : index
    %44 = vector.load %arg7[%c0_22, %c0_23, %c0_24] : memref<8x8x128xf32, #tpu.memory_space<vmem>>, vector<1x8x128xf32>
    %45 = vector.shape_cast %44 : vector<1x8x128xf32> to vector<8x128xf32>
    %46 = vector.shape_cast %40 : vector<8x128xf32> to vector<1x8x128xf32>
    tpu.vector_store %arg7[%c0_22, %c0_23, %c0_24], %46 {strides = array<i32>} : memref<8x8x128xf32, #tpu.memory_space<vmem>>, vector<1x8x128xf32>,
    %c1 = arith.constant 1 : index
    %c0_25 = arith.constant 0 : index
    %c0_26 = arith.constant 0 : index
    %47 = vector.load %arg2[%c1, %c0_25, %c0_26] : memref<8x8x512xf32, #tpu.memory_space<vmem>>, vector<1x8x512xf32>
    %48 = vector.shape_cast %47 : vector<1x8x512xf32> to vector<8x512xf32>
    %c0_27 = arith.constant 0 : index
    %c0_28 = arith.constant 0 : index
    %49 = vector.load %arg5[%c0_27, %c0_28] : memref<8x128xbf16, #tpu.memory_space<vmem>>, vector<8x128xbf16>
    %c0_29 = arith.constant 0 : index
    %c0_30 = arith.constant 0 : index
    %50 = vector.load %arg3[%c0_29, %c0_30] : memref<128x512xbf16, #tpu.memory_space<vmem>>, vector<128x512xbf16>
    %cst_31 = arith.constant dense<0.000000e+00> : vector<8x512xf32>
    %51 = tpu.matmul %49, %50, %cst_31 {dimension_numbers = #tpu.dot_dimension_numbers<[1], [0], [0], [1], [0, 0, 1, 1], [], []>} : vector<8x128xbf16>, vector<128x512xbf16>, vector<8x512xf32> -> vector<8x512xf32>
    %52 = arith.addf %48, %51 : vector<8x512xf32>
    %53 = vector.extract_strided_slice %52 {offsets = [0, 0], sizes = [8, 128], strides = [1, 1]} : vector<8x512xf32> to vector<8x128xf32>
    %cst_32 = arith.constant 5.000000e-01 : f32
    %54 = vector.broadcast %cst_32 : f32 to vector<8x128xf32>
    %55 = arith.mulf %54, %53 : vector<8x128xf32>
    %56 = math.tanh %55 : vector<8x128xf32>
    %cst_33 = arith.constant 5.000000e-01 : f32
    %57 = vector.broadcast %cst_33 : f32 to vector<8x128xf32>
    %58 = arith.mulf %57, %56 : vector<8x128xf32>
    %cst_34 = arith.constant 5.000000e-01 : f32
    %59 = vector.broadcast %cst_34 : f32 to vector<8x128xf32>
    %60 = arith.addf %58, %59 : vector<8x128xf32>
    %61 = vector.extract_strided_slice %52 {offsets = [0, 128], sizes = [8, 128], strides = [1, 1]} : vector<8x512xf32> to vector<8x128xf32>
    %cst_35 = arith.constant 5.000000e-01 : f32
    %62 = vector.broadcast %cst_35 : f32 to vector<8x128xf32>
    %63 = arith.mulf %62, %61 : vector<8x128xf32>
    %64 = math.tanh %63 : vector<8x128xf32>
    %cst_36 = arith.constant 5.000000e-01 : f32
    %65 = vector.broadcast %cst_36 : f32 to vector<8x128xf32>
    %66 = arith.mulf %65, %64 : vector<8x128xf32>
    %cst_37 = arith.constant 5.000000e-01 : f32
    %67 = vector.broadcast %cst_37 : f32 to vector<8x128xf32>
    %68 = arith.addf %66, %67 : vector<8x128xf32>
    %69 = vector.extract_strided_slice %52 {offsets = [0, 256], sizes = [8, 128], strides = [1, 1]} : vector<8x512xf32> to vector<8x128xf32>
    %70 = math.tanh %69 : vector<8x128xf32>
    %71 = vector.extract_strided_slice %52 {offsets = [0, 384], sizes = [8, 128], strides = [1, 1]} : vector<8x512xf32> to vector<8x128xf32>
    %cst_38 = arith.constant 5.000000e-01 : f32
    %72 = vector.broadcast %cst_38 : f32 to vector<8x128xf32>
    %73 = arith.mulf %72, %71 : vector<8x128xf32>
    %74 = math.tanh %73 : vector<8x128xf32>
    %cst_39 = arith.constant 5.000000e-01 : f32
    %75 = vector.broadcast %cst_39 : f32 to vector<8x128xf32>
    %76 = arith.mulf %75, %74 : vector<8x128xf32>
    %cst_40 = arith.constant 5.000000e-01 : f32
    %77 = vector.broadcast %cst_40 : f32 to vector<8x128xf32>
    %78 = arith.addf %76, %77 : vector<8x128xf32>
    %c0_41 = arith.constant 0 : index
    %c0_42 = arith.constant 0 : index
    %79 = vector.load %arg6[%c0_41, %c0_42] : memref<8x128xf32, #tpu.memory_space<vmem>>, vector<8x128xf32>
    %80 = arith.mulf %68, %79 : vector<8x128xf32>
    %81 = arith.mulf %60, %70 : vector<8x128xf32>
    %82 = arith.addf %80, %81 : vector<8x128xf32>
    %83 = math.tanh %82 : vector<8x128xf32>
    %84 = arith.mulf %78, %83 : vector<8x128xf32>
    %c0_43 = arith.constant 0 : index
    %c0_44 = arith.constant 0 : index
    %85 = vector.load %arg6[%c0_43, %c0_44] : memref<8x128xf32, #tpu.memory_space<vmem>>, vector<8x128xf32>
    tpu.vector_store %arg6[%c0_43, %c0_44], %82 {strides = array<i32>} : memref<8x128xf32, #tpu.memory_space<vmem>>, vector<8x128xf32>,
    %86 = arith.truncf %84 : vector<8x128xf32> to vector<8x128xbf16>
    %c0_45 = arith.constant 0 : index
    %c0_46 = arith.constant 0 : index
    %87 = vector.load %arg5[%c0_45, %c0_46] : memref<8x128xbf16, #tpu.memory_space<vmem>>, vector<8x128xbf16>
    tpu.vector_store %arg5[%c0_45, %c0_46], %86 {strides = array<i32>} : memref<8x128xbf16, #tpu.memory_space<vmem>>, vector<8x128xbf16>,
    %c1_47 = arith.constant 1 : index
    %c0_48 = arith.constant 0 : index
    %c0_49 = arith.constant 0 : index
    %88 = vector.load %arg7[%c1_47, %c0_48, %c0_49] : memref<8x8x128xf32, #tpu.memory_space<vmem>>, vector<1x8x128xf32>
    %89 = vector.shape_cast %88 : vector<1x8x128xf32> to vector<8x128xf32>
    %90 = vector.shape_cast %84 : vector<8x128xf32> to vector<1x8x128xf32>
    tpu.vector_store %arg7[%c1_47, %c0_48, %c0_49], %90 {strides = array<i32>} : memref<8x8x128xf32, #tpu.memory_space<vmem>>, vector<1x8x128xf32>,
    %c2 = arith.constant 2 : index
    %c0_50 = arith.constant 0 : index
    %c0_51 = arith.constant 0 : index
    %91 = vector.load %arg2[%c2, %c0_50, %c0_51] : memref<8x8x512xf32, #tpu.memory_space<vmem>>, vector<1x8x512xf32>
    %92 = vector.shape_cast %91 : vector<1x8x512xf32> to vector<8x512xf32>
    %c0_52 = arith.constant 0 : index
    %c0_53 = arith.constant 0 : index
    %93 = vector.load %arg5[%c0_52, %c0_53] : memref<8x128xbf16, #tpu.memory_space<vmem>>, vector<8x128xbf16>
    %c0_54 = arith.constant 0 : index
    %c0_55 = arith.constant 0 : index
    %94 = vector.load %arg3[%c0_54, %c0_55] : memref<128x512xbf16, #tpu.memory_space<vmem>>, vector<128x512xbf16>
    %cst_56 = arith.constant dense<0.000000e+00> : vector<8x512xf32>
    %95 = tpu.matmul %93, %94, %cst_56 {dimension_numbers = #tpu.dot_dimension_numbers<[1], [0], [0], [1], [0, 0, 1, 1], [], []>} : vector<8x128xbf16>, vector<128x512xbf16>, vector<8x512xf32> -> vector<8x512xf32>
    %96 = arith.addf %92, %95 : vector<8x512xf32>
    %97 = vector.extract_strided_slice %96 {offsets = [0, 0], sizes = [8, 128], strides = [1, 1]} : vector<8x512xf32> to vector<8x128xf32>
    %cst_57 = arith.constant 5.000000e-01 : f32
    %98 = vector.broadcast %cst_57 : f32 to vector<8x128xf32>
    %99 = arith.mulf %98, %97 : vector<8x128xf32>
    %100 = math.tanh %99 : vector<8x128xf32>
    %cst_58 = arith.constant 5.000000e-01 : f32
    %101 = vector.broadcast %cst_58 : f32 to vector<8x128xf32>
    %102 = arith.mulf %101, %100 : vector<8x128xf32>
    %cst_59 = arith.constant 5.000000e-01 : f32
    %103 = vector.broadcast %cst_59 : f32 to vector<8x128xf32>
    %104 = arith.addf %102, %103 : vector<8x128xf32>
    %105 = vector.extract_strided_slice %96 {offsets = [0, 128], sizes = [8, 128], strides = [1, 1]} : vector<8x512xf32> to vector<8x128xf32>
    %cst_60 = arith.constant 5.000000e-01 : f32
    %106 = vector.broadcast %cst_60 : f32 to vector<8x128xf32>
    %107 = arith.mulf %106, %105 : vector<8x128xf32>
    %108 = math.tanh %107 : vector<8x128xf32>
    %cst_61 = arith.constant 5.000000e-01 : f32
    %109 = vector.broadcast %cst_61 : f32 to vector<8x128xf32>
    %110 = arith.mulf %109, %108 : vector<8x128xf32>
    %cst_62 = arith.constant 5.000000e-01 : f32
    %111 = vector.broadcast %cst_62 : f32 to vector<8x128xf32>
    %112 = arith.addf %110, %111 : vector<8x128xf32>
    %113 = vector.extract_strided_slice %96 {offsets = [0, 256], sizes = [8, 128], strides = [1, 1]} : vector<8x512xf32> to vector<8x128xf32>
    %114 = math.tanh %113 : vector<8x128xf32>
    %115 = vector.extract_strided_slice %96 {offsets = [0, 384], sizes = [8, 128], strides = [1, 1]} : vector<8x512xf32> to vector<8x128xf32>
    %cst_63 = arith.constant 5.000000e-01 : f32
    %116 = vector.broadcast %cst_63 : f32 to vector<8x128xf32>
    %117 = arith.mulf %116, %115 : vector<8x128xf32>
    %118 = math.tanh %117 : vector<8x128xf32>
    %cst_64 = arith.constant 5.000000e-01 : f32
    %119 = vector.broadcast %cst_64 : f32 to vector<8x128xf32>
    %120 = arith.mulf %119, %118 : vector<8x128xf32>
    %cst_65 = arith.constant 5.000000e-01 : f32
    %121 = vector.broadcast %cst_65 : f32 to vector<8x128xf32>
    %122 = arith.addf %120, %121 : vector<8x128xf32>
    %c0_66 = arith.constant 0 : index
    %c0_67 = arith.constant 0 : index
    %123 = vector.load %arg6[%c0_66, %c0_67] : memref<8x128xf32, #tpu.memory_space<vmem>>, vector<8x128xf32>
    %124 = arith.mulf %112, %123 : vector<8x128xf32>
    %125 = arith.mulf %104, %114 : vector<8x128xf32>
    %126 = arith.addf %124, %125 : vector<8x128xf32>
    %127 = math.tanh %126 : vector<8x128xf32>
    %128 = arith.mulf %122, %127 : vector<8x128xf32>
    %c0_68 = arith.constant 0 : index
    %c0_69 = arith.constant 0 : index
    %129 = vector.load %arg6[%c0_68, %c0_69] : memref<8x128xf32, #tpu.memory_space<vmem>>, vector<8x128xf32>
    tpu.vector_store %arg6[%c0_68, %c0_69], %126 {strides = array<i32>} : memref<8x128xf32, #tpu.memory_space<vmem>>, vector<8x128xf32>,
    %130 = arith.truncf %128 : vector<8x128xf32> to vector<8x128xbf16>
    %c0_70 = arith.constant 0 : index
    %c0_71 = arith.constant 0 : index
    %131 = vector.load %arg5[%c0_70, %c0_71] : memref<8x128xbf16, #tpu.memory_space<vmem>>, vector<8x128xbf16>
    tpu.vector_store %arg5[%c0_70, %c0_71], %130 {strides = array<i32>} : memref<8x128xbf16, #tpu.memory_space<vmem>>, vector<8x128xbf16>,
    %c2_72 = arith.constant 2 : index
    %c0_73 = arith.constant 0 : index
    %c0_74 = arith.constant 0 : index
    %132 = vector.load %arg7[%c2_72, %c0_73, %c0_74] : memref<8x8x128xf32, #tpu.memory_space<vmem>>, vector<1x8x128xf32>
    %133 = vector.shape_cast %132 : vector<1x8x128xf32> to vector<8x128xf32>
    %134 = vector.shape_cast %128 : vector<8x128xf32> to vector<1x8x128xf32>
    tpu.vector_store %arg7[%c2_72, %c0_73, %c0_74], %134 {strides = array<i32>} : memref<8x8x128xf32, #tpu.memory_space<vmem>>, vector<1x8x128xf32>,
    %c3 = arith.constant 3 : index
    %c0_75 = arith.constant 0 : index
    %c0_76 = arith.constant 0 : index
    %135 = vector.load %arg2[%c3, %c0_75, %c0_76] : memref<8x8x512xf32, #tpu.memory_space<vmem>>, vector<1x8x512xf32>
    %136 = vector.shape_cast %135 : vector<1x8x512xf32> to vector<8x512xf32>
    %c0_77 = arith.constant 0 : index
    %c0_78 = arith.constant 0 : index
    %137 = vector.load %arg5[%c0_77, %c0_78] : memref<8x128xbf16, #tpu.memory_space<vmem>>, vector<8x128xbf16>
    %c0_79 = arith.constant 0 : index
    %c0_80 = arith.constant 0 : index
    %138 = vector.load %arg3[%c0_79, %c0_80] : memref<128x512xbf16, #tpu.memory_space<vmem>>, vector<128x512xbf16>
    %cst_81 = arith.constant dense<0.000000e+00> : vector<8x512xf32>
    %139 = tpu.matmul %137, %138, %cst_81 {dimension_numbers = #tpu.dot_dimension_numbers<[1], [0], [0], [1], [0, 0, 1, 1], [], []>} : vector<8x128xbf16>, vector<128x512xbf16>, vector<8x512xf32> -> vector<8x512xf32>
    %140 = arith.addf %136, %139 : vector<8x512xf32>
    %141 = vector.extract_strided_slice %140 {offsets = [0, 0], sizes = [8, 128], strides = [1, 1]} : vector<8x512xf32> to vector<8x128xf32>
    %cst_82 = arith.constant 5.000000e-01 : f32
    %142 = vector.broadcast %cst_82 : f32 to vector<8x128xf32>
    %143 = arith.mulf %142, %141 : vector<8x128xf32>
    %144 = math.tanh %143 : vector<8x128xf32>
    %cst_83 = arith.constant 5.000000e-01 : f32
    %145 = vector.broadcast %cst_83 : f32 to vector<8x128xf32>
    %146 = arith.mulf %145, %144 : vector<8x128xf32>
    %cst_84 = arith.constant 5.000000e-01 : f32
    %147 = vector.broadcast %cst_84 : f32 to vector<8x128xf32>
    %148 = arith.addf %146, %147 : vector<8x128xf32>
    %149 = vector.extract_strided_slice %140 {offsets = [0, 128], sizes = [8, 128], strides = [1, 1]} : vector<8x512xf32> to vector<8x128xf32>
    %cst_85 = arith.constant 5.000000e-01 : f32
    %150 = vector.broadcast %cst_85 : f32 to vector<8x128xf32>
    %151 = arith.mulf %150, %149 : vector<8x128xf32>
    %152 = math.tanh %151 : vector<8x128xf32>
    %cst_86 = arith.constant 5.000000e-01 : f32
    %153 = vector.broadcast %cst_86 : f32 to vector<8x128xf32>
    %154 = arith.mulf %153, %152 : vector<8x128xf32>
    %cst_87 = arith.constant 5.000000e-01 : f32
    %155 = vector.broadcast %cst_87 : f32 to vector<8x128xf32>
    %156 = arith.addf %154, %155 : vector<8x128xf32>
    %157 = vector.extract_strided_slice %140 {offsets = [0, 256], sizes = [8, 128], strides = [1, 1]} : vector<8x512xf32> to vector<8x128xf32>
    %158 = math.tanh %157 : vector<8x128xf32>
    %159 = vector.extract_strided_slice %140 {offsets = [0, 384], sizes = [8, 128], strides = [1, 1]} : vector<8x512xf32> to vector<8x128xf32>
    %cst_88 = arith.constant 5.000000e-01 : f32
    %160 = vector.broadcast %cst_88 : f32 to vector<8x128xf32>
    %161 = arith.mulf %160, %159 : vector<8x128xf32>
    %162 = math.tanh %161 : vector<8x128xf32>
    %cst_89 = arith.constant 5.000000e-01 : f32
    %163 = vector.broadcast %cst_89 : f32 to vector<8x128xf32>
    %164 = arith.mulf %163, %162 : vector<8x128xf32>
    %cst_90 = arith.constant 5.000000e-01 : f32
    %165 = vector.broadcast %cst_90 : f32 to vector<8x128xf32>
    %166 = arith.addf %164, %165 : vector<8x128xf32>
    %c0_91 = arith.constant 0 : index
    %c0_92 = arith.constant 0 : index
    %167 = vector.load %arg6[%c0_91, %c0_92] : memref<8x128xf32, #tpu.memory_space<vmem>>, vector<8x128xf32>
    %168 = arith.mulf %156, %167 : vector<8x128xf32>
    %169 = arith.mulf %148, %158 : vector<8x128xf32>
    %170 = arith.addf %168, %169 : vector<8x128xf32>
    %171 = math.tanh %170 : vector<8x128xf32>
    %172 = arith.mulf %166, %171 : vector<8x128xf32>
    %c0_93 = arith.constant 0 : index
    %c0_94 = arith.constant 0 : index
    %173 = vector.load %arg6[%c0_93, %c0_94] : memref<8x128xf32, #tpu.memory_space<vmem>>, vector<8x128xf32>
    tpu.vector_store %arg6[%c0_93, %c0_94], %170 {strides = array<i32>} : memref<8x128xf32, #tpu.memory_space<vmem>>, vector<8x128xf32>,
    %174 = arith.truncf %172 : vector<8x128xf32> to vector<8x128xbf16>
    %c0_95 = arith.constant 0 : index
    %c0_96 = arith.constant 0 : index
    %175 = vector.load %arg5[%c0_95, %c0_96] : memref<8x128xbf16, #tpu.memory_space<vmem>>, vector<8x128xbf16>
    tpu.vector_store %arg5[%c0_95, %c0_96], %174 {strides = array<i32>} : memref<8x128xbf16, #tpu.memory_space<vmem>>, vector<8x128xbf16>,
    %c3_97 = arith.constant 3 : index
    %c0_98 = arith.constant 0 : index
    %c0_99 = arith.constant 0 : index
    %176 = vector.load %arg7[%c3_97, %c0_98, %c0_99] : memref<8x8x128xf32, #tpu.memory_space<vmem>>, vector<1x8x128xf32>
    %177 = vector.shape_cast %176 : vector<1x8x128xf32> to vector<8x128xf32>
    %178 = vector.shape_cast %172 : vector<8x128xf32> to vector<1x8x128xf32>
    tpu.vector_store %arg7[%c3_97, %c0_98, %c0_99], %178 {strides = array<i32>} : memref<8x8x128xf32, #tpu.memory_space<vmem>>, vector<1x8x128xf32>,
    %c4 = arith.constant 4 : index
    %c0_100 = arith.constant 0 : index
    %c0_101 = arith.constant 0 : index
    %179 = vector.load %arg2[%c4, %c0_100, %c0_101] : memref<8x8x512xf32, #tpu.memory_space<vmem>>, vector<1x8x512xf32>
    %180 = vector.shape_cast %179 : vector<1x8x512xf32> to vector<8x512xf32>
    %c0_102 = arith.constant 0 : index
    %c0_103 = arith.constant 0 : index
    %181 = vector.load %arg5[%c0_102, %c0_103] : memref<8x128xbf16, #tpu.memory_space<vmem>>, vector<8x128xbf16>
    %c0_104 = arith.constant 0 : index
    %c0_105 = arith.constant 0 : index
    %182 = vector.load %arg3[%c0_104, %c0_105] : memref<128x512xbf16, #tpu.memory_space<vmem>>, vector<128x512xbf16>
    %cst_106 = arith.constant dense<0.000000e+00> : vector<8x512xf32>
    %183 = tpu.matmul %181, %182, %cst_106 {dimension_numbers = #tpu.dot_dimension_numbers<[1], [0], [0], [1], [0, 0, 1, 1], [], []>} : vector<8x128xbf16>, vector<128x512xbf16>, vector<8x512xf32> -> vector<8x512xf32>
    %184 = arith.addf %180, %183 : vector<8x512xf32>
    %185 = vector.extract_strided_slice %184 {offsets = [0, 0], sizes = [8, 128], strides = [1, 1]} : vector<8x512xf32> to vector<8x128xf32>
    %cst_107 = arith.constant 5.000000e-01 : f32
    %186 = vector.broadcast %cst_107 : f32 to vector<8x128xf32>
    %187 = arith.mulf %186, %185 : vector<8x128xf32>
    %188 = math.tanh %187 : vector<8x128xf32>
    %cst_108 = arith.constant 5.000000e-01 : f32
    %189 = vector.broadcast %cst_108 : f32 to vector<8x128xf32>
    %190 = arith.mulf %189, %188 : vector<8x128xf32>
    %cst_109 = arith.constant 5.000000e-01 : f32
    %191 = vector.broadcast %cst_109 : f32 to vector<8x128xf32>
    %192 = arith.addf %190, %191 : vector<8x128xf32>
    %193 = vector.extract_strided_slice %184 {offsets = [0, 128], sizes = [8, 128], strides = [1, 1]} : vector<8x512xf32> to vector<8x128xf32>
    %cst_110 = arith.constant 5.000000e-01 : f32
    %194 = vector.broadcast %cst_110 : f32 to vector<8x128xf32>
    %195 = arith.mulf %194, %193 : vector<8x128xf32>
    %196 = math.tanh %195 : vector<8x128xf32>
    %cst_111 = arith.constant 5.000000e-01 : f32
    %197 = vector.broadcast %cst_111 : f32 to vector<8x128xf32>
    %198 = arith.mulf %197, %196 : vector<8x128xf32>
    %cst_112 = arith.constant 5.000000e-01 : f32
    %199 = vector.broadcast %cst_112 : f32 to vector<8x128xf32>
    %200 = arith.addf %198, %199 : vector<8x128xf32>
    %201 = vector.extract_strided_slice %184 {offsets = [0, 256], sizes = [8, 128], strides = [1, 1]} : vector<8x512xf32> to vector<8x128xf32>
    %202 = math.tanh %201 : vector<8x128xf32>
    %203 = vector.extract_strided_slice %184 {offsets = [0, 384], sizes = [8, 128], strides = [1, 1]} : vector<8x512xf32> to vector<8x128xf32>
    %cst_113 = arith.constant 5.000000e-01 : f32
    %204 = vector.broadcast %cst_113 : f32 to vector<8x128xf32>
    %205 = arith.mulf %204, %203 : vector<8x128xf32>
    %206 = math.tanh %205 : vector<8x128xf32>
    %cst_114 = arith.constant 5.000000e-01 : f32
    %207 = vector.broadcast %cst_114 : f32 to vector<8x128xf32>
    %208 = arith.mulf %207, %206 : vector<8x128xf32>
    %cst_115 = arith.constant 5.000000e-01 : f32
    %209 = vector.broadcast %cst_115 : f32 to vector<8x128xf32>
    %210 = arith.addf %208, %209 : vector<8x128xf32>
    %c0_116 = arith.constant 0 : index
    %c0_117 = arith.constant 0 : index
    %211 = vector.load %arg6[%c0_116, %c0_117] : memref<8x128xf32, #tpu.memory_space<vmem>>, vector<8x128xf32>
    %212 = arith.mulf %200, %211 : vector<8x128xf32>
    %213 = arith.mulf %192, %202 : vector<8x128xf32>
    %214 = arith.addf %212, %213 : vector<8x128xf32>
    %215 = math.tanh %214 : vector<8x128xf32>
    %216 = arith.mulf %210, %215 : vector<8x128xf32>
    %c0_118 = arith.constant 0 : index
    %c0_119 = arith.constant 0 : index
    %217 = vector.load %arg6[%c0_118, %c0_119] : memref<8x128xf32, #tpu.memory_space<vmem>>, vector<8x128xf32>
    tpu.vector_store %arg6[%c0_118, %c0_119], %214 {strides = array<i32>} : memref<8x128xf32, #tpu.memory_space<vmem>>, vector<8x128xf32>,
    %218 = arith.truncf %216 : vector<8x128xf32> to vector<8x128xbf16>
    %c0_120 = arith.constant 0 : index
    %c0_121 = arith.constant 0 : index
    %219 = vector.load %arg5[%c0_120, %c0_121] : memref<8x128xbf16, #tpu.memory_space<vmem>>, vector<8x128xbf16>
    tpu.vector_store %arg5[%c0_120, %c0_121], %218 {strides = array<i32>} : memref<8x128xbf16, #tpu.memory_space<vmem>>, vector<8x128xbf16>,
    %c4_122 = arith.constant 4 : index
    %c0_123 = arith.constant 0 : index
    %c0_124 = arith.constant 0 : index
    %220 = vector.load %arg7[%c4_122, %c0_123, %c0_124] : memref<8x8x128xf32, #tpu.memory_space<vmem>>, vector<1x8x128xf32>
    %221 = vector.shape_cast %220 : vector<1x8x128xf32> to vector<8x128xf32>
    %222 = vector.shape_cast %216 : vector<8x128xf32> to vector<1x8x128xf32>
    tpu.vector_store %arg7[%c4_122, %c0_123, %c0_124], %222 {strides = array<i32>} : memref<8x8x128xf32, #tpu.memory_space<vmem>>, vector<1x8x128xf32>,
    %c5 = arith.constant 5 : index
    %c0_125 = arith.constant 0 : index
    %c0_126 = arith.constant 0 : index
    %223 = vector.load %arg2[%c5, %c0_125, %c0_126] : memref<8x8x512xf32, #tpu.memory_space<vmem>>, vector<1x8x512xf32>
    %224 = vector.shape_cast %223 : vector<1x8x512xf32> to vector<8x512xf32>
    %c0_127 = arith.constant 0 : index
    %c0_128 = arith.constant 0 : index
    %225 = vector.load %arg5[%c0_127, %c0_128] : memref<8x128xbf16, #tpu.memory_space<vmem>>, vector<8x128xbf16>
    %c0_129 = arith.constant 0 : index
    %c0_130 = arith.constant 0 : index
    %226 = vector.load %arg3[%c0_129, %c0_130] : memref<128x512xbf16, #tpu.memory_space<vmem>>, vector<128x512xbf16>
    %cst_131 = arith.constant dense<0.000000e+00> : vector<8x512xf32>
    %227 = tpu.matmul %225, %226, %cst_131 {dimension_numbers = #tpu.dot_dimension_numbers<[1], [0], [0], [1], [0, 0, 1, 1], [], []>} : vector<8x128xbf16>, vector<128x512xbf16>, vector<8x512xf32> -> vector<8x512xf32>
    %228 = arith.addf %224, %227 : vector<8x512xf32>
    %229 = vector.extract_strided_slice %228 {offsets = [0, 0], sizes = [8, 128], strides = [1, 1]} : vector<8x512xf32> to vector<8x128xf32>
    %cst_132 = arith.constant 5.000000e-01 : f32
    %230 = vector.broadcast %cst_132 : f32 to vector<8x128xf32>
    %231 = arith.mulf %230, %229 : vector<8x128xf32>
    %232 = math.tanh %231 : vector<8x128xf32>
    %cst_133 = arith.constant 5.000000e-01 : f32
    %233 = vector.broadcast %cst_133 : f32 to vector<8x128xf32>
    %234 = arith.mulf %233, %232 : vector<8x128xf32>
    %cst_134 = arith.constant 5.000000e-01 : f32
    %235 = vector.broadcast %cst_134 : f32 to vector<8x128xf32>
    %236 = arith.addf %234, %235 : vector<8x128xf32>
    %237 = vector.extract_strided_slice %228 {offsets = [0, 128], sizes = [8, 128], strides = [1, 1]} : vector<8x512xf32> to vector<8x128xf32>
    %cst_135 = arith.constant 5.000000e-01 : f32
    %238 = vector.broadcast %cst_135 : f32 to vector<8x128xf32>
    %239 = arith.mulf %238, %237 : vector<8x128xf32>
    %240 = math.tanh %239 : vector<8x128xf32>
    %cst_136 = arith.constant 5.000000e-01 : f32
    %241 = vector.broadcast %cst_136 : f32 to vector<8x128xf32>
    %242 = arith.mulf %241, %240 : vector<8x128xf32>
    %cst_137 = arith.constant 5.000000e-01 : f32
    %243 = vector.broadcast %cst_137 : f32 to vector<8x128xf32>
    %244 = arith.addf %242, %243 : vector<8x128xf32>
    %245 = vector.extract_strided_slice %228 {offsets = [0, 256], sizes = [8, 128], strides = [1, 1]} : vector<8x512xf32> to vector<8x128xf32>
    %246 = math.tanh %245 : vector<8x128xf32>
    %247 = vector.extract_strided_slice %228 {offsets = [0, 384], sizes = [8, 128], strides = [1, 1]} : vector<8x512xf32> to vector<8x128xf32>
    %cst_138 = arith.constant 5.000000e-01 : f32
    %248 = vector.broadcast %cst_138 : f32 to vector<8x128xf32>
    %249 = arith.mulf %248, %247 : vector<8x128xf32>
    %250 = math.tanh %249 : vector<8x128xf32>
    %cst_139 = arith.constant 5.000000e-01 : f32
    %251 = vector.broadcast %cst_139 : f32 to vector<8x128xf32>
    %252 = arith.mulf %251, %250 : vector<8x128xf32>
    %cst_140 = arith.constant 5.000000e-01 : f32
    %253 = vector.broadcast %cst_140 : f32 to vector<8x128xf32>
    %254 = arith.addf %252, %253 : vector<8x128xf32>
    %c0_141 = arith.constant 0 : index
    %c0_142 = arith.constant 0 : index
    %255 = vector.load %arg6[%c0_141, %c0_142] : memref<8x128xf32, #tpu.memory_space<vmem>>, vector<8x128xf32>
    %256 = arith.mulf %244, %255 : vector<8x128xf32>
    %257 = arith.mulf %236, %246 : vector<8x128xf32>
    %258 = arith.addf %256, %257 : vector<8x128xf32>
    %259 = math.tanh %258 : vector<8x128xf32>
    %260 = arith.mulf %254, %259 : vector<8x128xf32>
    %c0_143 = arith.constant 0 : index
    %c0_144 = arith.constant 0 : index
    %261 = vector.load %arg6[%c0_143, %c0_144] : memref<8x128xf32, #tpu.memory_space<vmem>>, vector<8x128xf32>
    tpu.vector_store %arg6[%c0_143, %c0_144], %258 {strides = array<i32>} : memref<8x128xf32, #tpu.memory_space<vmem>>, vector<8x128xf32>,
    %262 = arith.truncf %260 : vector<8x128xf32> to vector<8x128xbf16>
    %c0_145 = arith.constant 0 : index
    %c0_146 = arith.constant 0 : index
    %263 = vector.load %arg5[%c0_145, %c0_146] : memref<8x128xbf16, #tpu.memory_space<vmem>>, vector<8x128xbf16>
    tpu.vector_store %arg5[%c0_145, %c0_146], %262 {strides = array<i32>} : memref<8x128xbf16, #tpu.memory_space<vmem>>, vector<8x128xbf16>,
    %c5_147 = arith.constant 5 : index
    %c0_148 = arith.constant 0 : index
    %c0_149 = arith.constant 0 : index
    %264 = vector.load %arg7[%c5_147, %c0_148, %c0_149] : memref<8x8x128xf32, #tpu.memory_space<vmem>>, vector<1x8x128xf32>
    %265 = vector.shape_cast %264 : vector<1x8x128xf32> to vector<8x128xf32>
    %266 = vector.shape_cast %260 : vector<8x128xf32> to vector<1x8x128xf32>
    tpu.vector_store %arg7[%c5_147, %c0_148, %c0_149], %266 {strides = array<i32>} : memref<8x8x128xf32, #tpu.memory_space<vmem>>, vector<1x8x128xf32>,
    %c6 = arith.constant 6 : index
    %c0_150 = arith.constant 0 : index
    %c0_151 = arith.constant 0 : index
    %267 = vector.load %arg2[%c6, %c0_150, %c0_151] : memref<8x8x512xf32, #tpu.memory_space<vmem>>, vector<1x8x512xf32>
    %268 = vector.shape_cast %267 : vector<1x8x512xf32> to vector<8x512xf32>
    %c0_152 = arith.constant 0 : index
    %c0_153 = arith.constant 0 : index
    %269 = vector.load %arg5[%c0_152, %c0_153] : memref<8x128xbf16, #tpu.memory_space<vmem>>, vector<8x128xbf16>
    %c0_154 = arith.constant 0 : index
    %c0_155 = arith.constant 0 : index
    %270 = vector.load %arg3[%c0_154, %c0_155] : memref<128x512xbf16, #tpu.memory_space<vmem>>, vector<128x512xbf16>
    %cst_156 = arith.constant dense<0.000000e+00> : vector<8x512xf32>
    %271 = tpu.matmul %269, %270, %cst_156 {dimension_numbers = #tpu.dot_dimension_numbers<[1], [0], [0], [1], [0, 0, 1, 1], [], []>} : vector<8x128xbf16>, vector<128x512xbf16>, vector<8x512xf32> -> vector<8x512xf32>
    %272 = arith.addf %268, %271 : vector<8x512xf32>
    %273 = vector.extract_strided_slice %272 {offsets = [0, 0], sizes = [8, 128], strides = [1, 1]} : vector<8x512xf32> to vector<8x128xf32>
    %cst_157 = arith.constant 5.000000e-01 : f32
    %274 = vector.broadcast %cst_157 : f32 to vector<8x128xf32>
    %275 = arith.mulf %274, %273 : vector<8x128xf32>
    %276 = math.tanh %275 : vector<8x128xf32>
    %cst_158 = arith.constant 5.000000e-01 : f32
    %277 = vector.broadcast %cst_158 : f32 to vector<8x128xf32>
    %278 = arith.mulf %277, %276 : vector<8x128xf32>
    %cst_159 = arith.constant 5.000000e-01 : f32
    %279 = vector.broadcast %cst_159 : f32 to vector<8x128xf32>
    %280 = arith.addf %278, %279 : vector<8x128xf32>
    %281 = vector.extract_strided_slice %272 {offsets = [0, 128], sizes = [8, 128], strides = [1, 1]} : vector<8x512xf32> to vector<8x128xf32>
    %cst_160 = arith.constant 5.000000e-01 : f32
    %282 = vector.broadcast %cst_160 : f32 to vector<8x128xf32>
    %283 = arith.mulf %282, %281 : vector<8x128xf32>
    %284 = math.tanh %283 : vector<8x128xf32>
    %cst_161 = arith.constant 5.000000e-01 : f32
    %285 = vector.broadcast %cst_161 : f32 to vector<8x128xf32>
    %286 = arith.mulf %285, %284 : vector<8x128xf32>
    %cst_162 = arith.constant 5.000000e-01 : f32
    %287 = vector.broadcast %cst_162 : f32 to vector<8x128xf32>
    %288 = arith.addf %286, %287 : vector<8x128xf32>
    %289 = vector.extract_strided_slice %272 {offsets = [0, 256], sizes = [8, 128], strides = [1, 1]} : vector<8x512xf32> to vector<8x128xf32>
    %290 = math.tanh %289 : vector<8x128xf32>
    %291 = vector.extract_strided_slice %272 {offsets = [0, 384], sizes = [8, 128], strides = [1, 1]} : vector<8x512xf32> to vector<8x128xf32>
    %cst_163 = arith.constant 5.000000e-01 : f32
    %292 = vector.broadcast %cst_163 : f32 to vector<8x128xf32>
    %293 = arith.mulf %292, %291 : vector<8x128xf32>
    %294 = math.tanh %293 : vector<8x128xf32>
    %cst_164 = arith.constant 5.000000e-01 : f32
    %295 = vector.broadcast %cst_164 : f32 to vector<8x128xf32>
    %296 = arith.mulf %295, %294 : vector<8x128xf32>
    %cst_165 = arith.constant 5.000000e-01 : f32
    %297 = vector.broadcast %cst_165 : f32 to vector<8x128xf32>
    %298 = arith.addf %296, %297 : vector<8x128xf32>
    %c0_166 = arith.constant 0 : index
    %c0_167 = arith.constant 0 : index
    %299 = vector.load %arg6[%c0_166, %c0_167] : memref<8x128xf32, #tpu.memory_space<vmem>>, vector<8x128xf32>
    %300 = arith.mulf %288, %299 : vector<8x128xf32>
    %301 = arith.mulf %280, %290 : vector<8x128xf32>
    %302 = arith.addf %300, %301 : vector<8x128xf32>
    %303 = math.tanh %302 : vector<8x128xf32>
    %304 = arith.mulf %298, %303 : vector<8x128xf32>
    %c0_168 = arith.constant 0 : index
    %c0_169 = arith.constant 0 : index
    %305 = vector.load %arg6[%c0_168, %c0_169] : memref<8x128xf32, #tpu.memory_space<vmem>>, vector<8x128xf32>
    tpu.vector_store %arg6[%c0_168, %c0_169], %302 {strides = array<i32>} : memref<8x128xf32, #tpu.memory_space<vmem>>, vector<8x128xf32>,
    %306 = arith.truncf %304 : vector<8x128xf32> to vector<8x128xbf16>
    %c0_170 = arith.constant 0 : index
    %c0_171 = arith.constant 0 : index
    %307 = vector.load %arg5[%c0_170, %c0_171] : memref<8x128xbf16, #tpu.memory_space<vmem>>, vector<8x128xbf16>
    tpu.vector_store %arg5[%c0_170, %c0_171], %306 {strides = array<i32>} : memref<8x128xbf16, #tpu.memory_space<vmem>>, vector<8x128xbf16>,
    %c6_172 = arith.constant 6 : index
    %c0_173 = arith.constant 0 : index
    %c0_174 = arith.constant 0 : index
    %308 = vector.load %arg7[%c6_172, %c0_173, %c0_174] : memref<8x8x128xf32, #tpu.memory_space<vmem>>, vector<1x8x128xf32>
    %309 = vector.shape_cast %308 : vector<1x8x128xf32> to vector<8x128xf32>
    %310 = vector.shape_cast %304 : vector<8x128xf32> to vector<1x8x128xf32>
    tpu.vector_store %arg7[%c6_172, %c0_173, %c0_174], %310 {strides = array<i32>} : memref<8x8x128xf32, #tpu.memory_space<vmem>>, vector<1x8x128xf32>,
    %c7 = arith.constant 7 : index
    %c0_175 = arith.constant 0 : index
    %c0_176 = arith.constant 0 : index
    %311 = vector.load %arg2[%c7, %c0_175, %c0_176] : memref<8x8x512xf32, #tpu.memory_space<vmem>>, vector<1x8x512xf32>
    %312 = vector.shape_cast %311 : vector<1x8x512xf32> to vector<8x512xf32>
    %c0_177 = arith.constant 0 : index
    %c0_178 = arith.constant 0 : index
    %313 = vector.load %arg5[%c0_177, %c0_178] : memref<8x128xbf16, #tpu.memory_space<vmem>>, vector<8x128xbf16>
    %c0_179 = arith.constant 0 : index
    %c0_180 = arith.constant 0 : index
    %314 = vector.load %arg3[%c0_179, %c0_180] : memref<128x512xbf16, #tpu.memory_space<vmem>>, vector<128x512xbf16>
    %cst_181 = arith.constant dense<0.000000e+00> : vector<8x512xf32>
    %315 = tpu.matmul %313, %314, %cst_181 {dimension_numbers = #tpu.dot_dimension_numbers<[1], [0], [0], [1], [0, 0, 1, 1], [], []>} : vector<8x128xbf16>, vector<128x512xbf16>, vector<8x512xf32> -> vector<8x512xf32>
    %316 = arith.addf %312, %315 : vector<8x512xf32>
    %317 = vector.extract_strided_slice %316 {offsets = [0, 0], sizes = [8, 128], strides = [1, 1]} : vector<8x512xf32> to vector<8x128xf32>
    %cst_182 = arith.constant 5.000000e-01 : f32
    %318 = vector.broadcast %cst_182 : f32 to vector<8x128xf32>
    %319 = arith.mulf %318, %317 : vector<8x128xf32>
    %320 = math.tanh %319 : vector<8x128xf32>
    %cst_183 = arith.constant 5.000000e-01 : f32
    %321 = vector.broadcast %cst_183 : f32 to vector<8x128xf32>
    %322 = arith.mulf %321, %320 : vector<8x128xf32>
    %cst_184 = arith.constant 5.000000e-01 : f32
    %323 = vector.broadcast %cst_184 : f32 to vector<8x128xf32>
    %324 = arith.addf %322, %323 : vector<8x128xf32>
    %325 = vector.extract_strided_slice %316 {offsets = [0, 128], sizes = [8, 128], strides = [1, 1]} : vector<8x512xf32> to vector<8x128xf32>
    %cst_185 = arith.constant 5.000000e-01 : f32
    %326 = vector.broadcast %cst_185 : f32 to vector<8x128xf32>
    %327 = arith.mulf %326, %325 : vector<8x128xf32>
    %328 = math.tanh %327 : vector<8x128xf32>
    %cst_186 = arith.constant 5.000000e-01 : f32
    %329 = vector.broadcast %cst_186 : f32 to vector<8x128xf32>
    %330 = arith.mulf %329, %328 : vector<8x128xf32>
    %cst_187 = arith.constant 5.000000e-01 : f32
    %331 = vector.broadcast %cst_187 : f32 to vector<8x128xf32>
    %332 = arith.addf %330, %331 : vector<8x128xf32>
    %333 = vector.extract_strided_slice %316 {offsets = [0, 256], sizes = [8, 128], strides = [1, 1]} : vector<8x512xf32> to vector<8x128xf32>
    %334 = math.tanh %333 : vector<8x128xf32>
    %335 = vector.extract_strided_slice %316 {offsets = [0, 384], sizes = [8, 128], strides = [1, 1]} : vector<8x512xf32> to vector<8x128xf32>
    %cst_188 = arith.constant 5.000000e-01 : f32
    %336 = vector.broadcast %cst_188 : f32 to vector<8x128xf32>
    %337 = arith.mulf %336, %335 : vector<8x128xf32>
    %338 = math.tanh %337 : vector<8x128xf32>
    %cst_189 = arith.constant 5.000000e-01 : f32
    %339 = vector.broadcast %cst_189 : f32 to vector<8x128xf32>
    %340 = arith.mulf %339, %338 : vector<8x128xf32>
    %cst_190 = arith.constant 5.000000e-01 : f32
    %341 = vector.broadcast %cst_190 : f32 to vector<8x128xf32>
    %342 = arith.addf %340, %341 : vector<8x128xf32>
    %c0_191 = arith.constant 0 : index
    %c0_192 = arith.constant 0 : index
    %343 = vector.load %arg6[%c0_191, %c0_192] : memref<8x128xf32, #tpu.memory_space<vmem>>, vector<8x128xf32>
    %344 = arith.mulf %332, %343 : vector<8x128xf32>
    %345 = arith.mulf %324, %334 : vector<8x128xf32>
    %346 = arith.addf %344, %345 : vector<8x128xf32>
    %347 = math.tanh %346 : vector<8x128xf32>
    %348 = arith.mulf %342, %347 : vector<8x128xf32>
    %c0_193 = arith.constant 0 : index
    %c0_194 = arith.constant 0 : index
    %349 = vector.load %arg6[%c0_193, %c0_194] : memref<8x128xf32, #tpu.memory_space<vmem>>, vector<8x128xf32>
    tpu.vector_store %arg6[%c0_193, %c0_194], %346 {strides = array<i32>} : memref<8x128xf32, #tpu.memory_space<vmem>>, vector<8x128xf32>,
    %350 = arith.truncf %348 : vector<8x128xf32> to vector<8x128xbf16>
    %c0_195 = arith.constant 0 : index
    %c0_196 = arith.constant 0 : index
    %351 = vector.load %arg5[%c0_195, %c0_196] : memref<8x128xbf16, #tpu.memory_space<vmem>>, vector<8x128xbf16>
    tpu.vector_store %arg5[%c0_195, %c0_196], %350 {strides = array<i32>} : memref<8x128xbf16, #tpu.memory_space<vmem>>, vector<8x128xbf16>,
    %c7_197 = arith.constant 7 : index
    %c0_198 = arith.constant 0 : index
    %c0_199 = arith.constant 0 : index
    %352 = vector.load %arg7[%c7_197, %c0_198, %c0_199] : memref<8x8x128xf32, #tpu.memory_space<vmem>>, vector<1x8x128xf32>
    %353 = vector.shape_cast %352 : vector<1x8x128xf32> to vector<8x128xf32>
    %354 = vector.shape_cast %348 : vector<8x128xf32> to vector<1x8x128xf32>
    tpu.vector_store %arg7[%c7_197, %c0_198, %c0_199], %354 {strides = array<i32>} : memref<8x8x128xf32, #tpu.memory_space<vmem>>, vector<1x8x128xf32>,
    %c0_200 = arith.constant 0 : index
    %c0_201 = arith.constant 0 : index
    %c0_202 = arith.constant 0 : index
    %355 = vector.load %arg7[%c0_200, %c0_201, %c0_202] : memref<8x8x128xf32, #tpu.memory_space<vmem>>, vector<8x8x128xf32>
    %356 = tpu.transpose %355, [1, 0, 2] : vector<8x8x128xf32> -> vector<8x8x128xf32>
    %357 = arith.truncf %356 : vector<8x8x128xf32> to vector<8x8x128xbf16>
    %c0_203 = arith.constant 0 : index
    %c0_204 = arith.constant 0 : index
    %c0_205 = arith.constant 0 : index
    %358 = vector.load %arg4[%c0_203, %c0_204, %c0_205] : memref<8x8x128xbf16, #tpu.memory_space<vmem>>, vector<8x8x128xbf16>
    tpu.vector_store %arg4[%c0_203, %c0_204, %c0_205], %357 {strides = array<i32>} : memref<8x8x128xbf16, #tpu.memory_space<vmem>>, vector<8x8x128xbf16>,
    return
  }
  func.func @transform_0(%arg0: i32, %arg1: i32) -> (i32, i32, i32) {
    %c0_i32 = arith.constant 0 : i32
    %c0_i32_0 = arith.constant 0 : i32
    return %arg1, %arg0, %c0_i32 : i32, i32, i32
  }
  func.func @transform_1(%arg0: i32, %arg1: i32) -> (i32, i32) {
    %c0_i32 = arith.constant 0 : i32
    %c0_i32_0 = arith.constant 0 : i32
    %c0_i32_1 = arith.constant 0 : i32
    return %c0_i32, %c0_i32_0 : i32, i32
  }
  func.func @transform_2(%arg0: i32, %arg1: i32) -> (i32, i32, i32) {
    %c0_i32 = arith.constant 0 : i32
    %c0_i32_0 = arith.constant 0 : i32
    return %arg0, %arg1, %c0_i32 : i32, i32, i32
  }
}

module attributes {stable_mosaic.version = 11 : i64} {
  func.func @dkt_fc_kernel(%arg0: i32, %arg1: i32, %arg2: memref<64x128xbf16, #tpu.memory_space<vmem>>, %arg3: memref<128x128xbf16, #tpu.memory_space<vmem>>, %arg4: memref<1x128xf32, #tpu.memory_space<vmem>>, %arg5: memref<64x128xf32, #tpu.memory_space<vmem>>) attributes {dimension_semantics = [#tpu.dimension_semantics<parallel>, #tpu.dimension_semantics<parallel>], iteration_bounds = array<i64: 1, 1>, scalar_prefetch = 0 : i64, scratch_operands = 0 : i64, tpu.core_type = #tpu.core_type<tc>, window_params = [{transform_indices = @transform_0, window_bounds = array<i64: 64, 128>}, {transform_indices = @transform_1, window_bounds = array<i64: 128, 128>}, {transform_indices = @transform_2, window_bounds = array<i64: 1, 128>}, {transform_indices = @transform_3, window_bounds = array<i64: 64, 128>}]} {
    %c0 = arith.constant 0 : index
    %c0_0 = arith.constant 0 : index
    %0 = vector.load %arg2[%c0, %c0_0] : memref<64x128xbf16, #tpu.memory_space<vmem>>, vector<64x128xbf16>
    %c0_1 = arith.constant 0 : index
    %c0_2 = arith.constant 0 : index
    %1 = vector.load %arg3[%c0_1, %c0_2] : memref<128x128xbf16, #tpu.memory_space<vmem>>, vector<128x128xbf16>
    %cst = arith.constant dense<0.000000e+00> : vector<64x128xf32>
    %2 = tpu.matmul %0, %1, %cst {dimension_numbers = #tpu.dot_dimension_numbers<[1], [0], [0], [1], [0, 0, 1, 1], [], []>} : vector<64x128xbf16>, vector<128x128xbf16>, vector<64x128xf32> -> vector<64x128xf32>
    %c0_3 = arith.constant 0 : index
    %c0_4 = arith.constant 0 : index
    %3 = vector.load %arg4[%c0_3, %c0_4] : memref<1x128xf32, #tpu.memory_space<vmem>>, vector<1x128xf32>
    %4 = vector.broadcast %3 : vector<1x128xf32> to vector<64x128xf32>
    %5 = arith.addf %2, %4 : vector<64x128xf32>
    %6 = arith.negf %5 : vector<64x128xf32>
    %7 = math.exp %6 : vector<64x128xf32>
    %cst_5 = arith.constant 1.000000e+00 : f32
    %8 = vector.broadcast %cst_5 : f32 to vector<64x128xf32>
    %9 = arith.addf %8, %7 : vector<64x128xf32>
    %10 = arith.divf %8, %9 : vector<64x128xf32>
    %c0_6 = arith.constant 0 : index
    %c0_7 = arith.constant 0 : index
    %11 = vector.load %arg5[%c0_6, %c0_7] : memref<64x128xf32, #tpu.memory_space<vmem>>, vector<64x128xf32>
    tpu.vector_store %arg5[%c0_6, %c0_7], %10 {strides = array<i32>} : memref<64x128xf32, #tpu.memory_space<vmem>>, vector<64x128xf32>,
    return
  }
  func.func @transform_0(%arg0: i32, %arg1: i32) -> (i32, i32) {
    %c0_i32 = arith.constant 0 : i32
    %c0_i32_0 = arith.constant 0 : i32
    return %arg0, %c0_i32 : i32, i32
  }
  func.func @transform_1(%arg0: i32, %arg1: i32) -> (i32, i32) {
    %c0_i32 = arith.constant 0 : i32
    %c0_i32_0 = arith.constant 0 : i32
    return %c0_i32, %arg1 : i32, i32
  }
  func.func @transform_2(%arg0: i32, %arg1: i32) -> (i32, i32) {
    %c0_i32 = arith.constant 0 : i32
    %c0_i32_0 = arith.constant 0 : i32
    return %c0_i32, %arg1 : i32, i32
  }
  func.func @transform_3(%arg0: i32, %arg1: i32) -> (i32, i32) {
    %c0_i32 = arith.constant 0 : i32
    return %arg0, %arg1 : i32, i32
  }
}

</mosaic_0001>

<bundles_post_ra>
// kernel: dkt_forward.3
= control target key start
LH: loop header
LB: loop body
LE: loop exit
PB: predicated region body
PF: predicated region fallthrough
CT: control target
= control target key end

     0   :  { %v532_v1 = vmov 0   ;;  %v57_v37 = vlaneseq  ;;  %s808_s1 = inlined_call_operand.vmem [shape: bf16[128,512], index: 1, kind: input, shape index: {}]   ;;  %s809_s0 = inlined_call_operand.vmem [shape: bf16[64,128], index: 0, kind: input, shape index: {}]   ;;  %s810_s2 = inlined_call_operand.vmem [shape: f32[1,512], index: 2, kind: input, shape index: {}]   ;;  %s811_s3 = inlined_call_operand.vmem [shape: f32[64,512], index: 3, kind: output, shape index: {}]  }
   0x1   :  { %v480_v0 = vld [vmem:[%s808_s1 + $0x4] ss:$16 sps:$4 sm:$0xff]   ;;  %293 = vmatprep.mubr.bf16.mxu0 %v532_v1  ;;  %366 = vmatprep.mubr.bf16.mxu1 %v532_v1  ;;  %v482_v2 = vld [vmem:[%s808_s1 + $0xc] ss:$16 sps:$4 sm:$0xff]   ;;  %v484_v3 = vld [vmem:[%s808_s1] ss:$16 sps:$4 sm:$0xff]  }
   0x2   :  { %261 = vmatprep.subr.bf16.mxu0 %v480_v0  ;;  %v485_v4 = vld [vmem:[%s808_s1 + $0x8] ss:$16 sps:$4 sm:$0xff]   ;;  %334 = vmatprep.subr.bf16.mxu1 %v482_v2  ;;  %v486_v5 = vld [vmem:[%s808_s1 + $0x24] ss:$16 sps:$4 sm:$0xff]   ;;  %v488_v6 = vld [vmem:[%s808_s1 + $0x2c] ss:$16 sps:$4 sm:$0xff]  }
   0x3   :  { %262 = vmatpush1.bf16.msra.mxu0 %v484_v3  ;;  %335 = vmatpush1.bf16.msra.mxu1 %v485_v4  ;;  %v490_v7 = vld [vmem:[%s808_s1 + $0x20] ss:$16 sps:$4 sm:$0xff]   ;;  %v491_v8 = vld [vmem:[%s808_s1 + $0x28] ss:$16 sps:$4 sm:$0xff]   ;;  %v492_v9 = vld [vmem:[%s808_s1 + $0x44] ss:$16 sps:$4 sm:$0xff]  }
   0x4   :  { %263 = vmatprep.subr.bf16.mxu0 %v486_v5  ;;  %336 = vmatprep.subr.bf16.mxu1 %v488_v6  ;;  %v494_v10 = vld [vmem:[%s808_s1 + $0x4c] ss:$16 sps:$4 sm:$0xff]   ;;  %v496_v11 = vld [vmem:[%s808_s1 + $0x40] ss:$16 sps:$4 sm:$0xff]   ;;  %v497_v12 = vld [vmem:[%s808_s1 + $0x48] ss:$16 sps:$4 sm:$0xff]  }
   0x5   :  { %v498_v13 = vld [vmem:[%s808_s1 + $0x64] ss:$16 sps:$4 sm:$0xff]   ;;  %v500_v14 = vld [vmem:[%s808_s1 + $0x6c] ss:$16 sps:$4 sm:$0xff]   ;;  %v502_v15 = vld [vmem:[%s808_s1 + $0x60] ss:$16 sps:$4 sm:$0xff]  }
   0x6   :  { %v503_v16 = vld [vmem:[%s808_s1 + $0x68] ss:$16 sps:$4 sm:$0xff]   ;;  %v504_v17 = vld [vmem:[%s808_s1 + $0x84] ss:$16 sps:$4 sm:$0xff]   ;;  %v506_v18 = vld [vmem:[%s808_s1 + $0x8c] ss:$16 sps:$4 sm:$0xff]  }
   0x7   :  { %264 = vmatpush1.bf16.msra.mxu0 %v490_v7  ;;  %337 = vmatpush1.bf16.msra.mxu1 %v491_v8  ;;  %v508_v19 = vld [vmem:[%s808_s1 + $0x80] ss:$16 sps:$4 sm:$0xff]   ;;  %v509_v20 = vld [vmem:[%s808_s1 + $0x88] ss:$16 sps:$4 sm:$0xff]   ;;  %v510_v21 = vld [vmem:[%s808_s1 + $0xa4] ss:$16 sps:$4 sm:$0xff]  }
   0x8   :  { %265 = vmatprep.subr.bf16.mxu0 %v492_v9  ;;  %338 = vmatprep.subr.bf16.mxu1 %v494_v10  ;;  %v512_v22 = vld [vmem:[%s808_s1 + $0xac] ss:$16 sps:$4 sm:$0xff]   ;;  %v514_v23 = vld [vmem:[%s808_s1 + $0xa0] ss:$16 sps:$4 sm:$0xff]   ;;  %v515_v24 = vld [vmem:[%s808_s1 + $0xa8] ss:$16 sps:$4 sm:$0xff]  }
   0x9   :  { %v516_v25 = vld [vmem:[%s808_s1 + $0xc4] ss:$16 sps:$4 sm:$0xff]   ;;  %v518_v26 = vld [vmem:[%s808_s1 + $0xcc] ss:$16 sps:$4 sm:$0xff]   ;;  %v520_v27 = vld [vmem:[%s808_s1 + $0xc0] ss:$16 sps:$4 sm:$0xff]  }
   0xa   :  { %v521_v28 = vld [vmem:[%s808_s1 + $0xc8] ss:$16 sps:$4 sm:$0xff]   ;;  %v522_v29 = vld [vmem:[%s808_s1 + $0xe4] ss:$16 sps:$4 sm:$0xff]   ;;  %v524_v30 = vld [vmem:[%s808_s1 + $0xec] ss:$16 sps:$4 sm:$0xff]  }
   0xb   :  { %266 = vmatpush1.bf16.msra.mxu0 %v496_v11  ;;  %339 = vmatpush1.bf16.msra.mxu1 %v497_v12  ;;  %v526_v31 = vld [vmem:[%s808_s1 + $0xe0] ss:$16 sps:$4 sm:$0xff]   ;;  %v527_v32 = vld [vmem:[%s808_s1 + $0xe8] ss:$16 sps:$4 sm:$0xff]   ;;  %v58_v38 = vshrl.u32 %v57_v37, 7 }
   0xc   :  { %267 = vmatprep.subr.bf16.mxu0 %v498_v13  ;;  %340 = vmatprep.subr.bf16.mxu1 %v500_v14  ;;  %v528_v33 = vld [vmem:[%s809_s0] sm:$0xff]   ;;  %v529_v34 = vld [vmem:[%s809_s0 + $0x8] sm:$0xff]   ;;  %v530_v35 = vld [vmem:[%s809_s0 + $0x10] sm:$0xff]  }
   0xd   :  { %v531_v36 = vld [vmem:[%s809_s0 + $0x18] sm:$0xff]   ;;  %v59_v39 = vsub.s32 0, %v58_v38  ;;  %v67_v40 = vsub.s32 2, %v58_v38  ;;  %v55_v41 = vld [vmem:[%s810_s2] sm:$0xf]  ;;  %v63_v42 = vsub.s32 1, %v58_v38 }
   0xe   :  { %v71_v43 = vsub.s32 3, %v58_v38 }
   0xf   :  { %268 = vmatpush1.bf16.msra.mxu0 %v502_v15  ;;  %341 = vmatpush1.bf16.msra.mxu1 %v503_v16  ;;  %v672_v44 = vrot.slane %v55_v41, %v59_v39  ;;  %v674_v45 = vrot.slane %v55_v41, %v67_v40  ;;  %v676_v46 = vrot.slane %v55_v41, %v63_v42 }
  0x10   :  { %269 = vmatprep.subr.bf16.mxu0 %v504_v17  ;;  %342 = vmatprep.subr.bf16.mxu1 %v506_v18  ;;  %v678_v47 = vrot.slane %v55_v41, %v71_v43 }
  0x13   :  { %270 = vmatpush1.bf16.msra.mxu0 %v508_v19  ;;  %343 = vmatpush1.bf16.msra.mxu1 %v509_v20 }
  0x14   :  { %271 = vmatprep.subr.bf16.mxu0 %v510_v21  ;;  %344 = vmatprep.subr.bf16.mxu1 %v512_v22 }
  0x17   :  { %272 = vmatpush1.bf16.msra.mxu0 %v514_v23  ;;  %345 = vmatpush1.bf16.msra.mxu1 %v515_v24 }
  0x18   :  { %273 = vmatprep.subr.bf16.mxu0 %v516_v25  ;;  %346 = vmatprep.subr.bf16.mxu1 %v518_v26 }
  0x1b   :  { %274 = vmatpush1.bf16.msra.mxu0 %v520_v27  ;;  %347 = vmatpush1.bf16.msra.mxu1 %v521_v28 }
  0x1c   :  { %275 = vmatprep.subr.bf16.mxu0 %v522_v29  ;;  %348 = vmatprep.subr.bf16.mxu1 %v524_v30 }
  0x1f   :  { %276 = vmatpush1.bf16.msra.mxu0 %v526_v31  ;;  %349 = vmatpush1.bf16.msra.mxu1 %v527_v32 }
  0x22   :  { %294 = vmatmul.mubr.bf16.vlgmr.msra.gmra.mrb[0].mxu0 %v528_v33  ;;  %367 = vmatmul.mubr.bf16.vlgmr.msra.gmra.mrb[0].mxu1 %v528_v33 }
  0x23   :  { %303 = vmatprep.mubr.bf16.mxu0 %v532_v1  ;;  %376 = vmatprep.mubr.bf16.mxu1 %v532_v1 }
  0x2a   :  { %304 = vmatmul.mubr.bf16.gmra.mrb[4].mxu0 %v529_v34  ;;  %377 = vmatmul.mubr.bf16.gmra.mrb[4].mxu1 %v529_v34 }
  0x2b   :  { %313 = vmatprep.mubr.bf16.mxu0 %v532_v1  ;;  %386 = vmatprep.mubr.bf16.mxu1 %v532_v1 }
  0x32   :  { %314 = vmatmul.mubr.bf16.gmra.mrb[8].mxu0 %v530_v35  ;;  %387 = vmatmul.mubr.bf16.gmra.mrb[8].mxu1 %v530_v35 }
  0x33   :  { %323 = vmatprep.mubr.bf16.mxu0 %v532_v1  ;;  %396 = vmatprep.mubr.bf16.mxu1 %v532_v1 }
  0x3a   :  { %324 = vmatmul.mubr.bf16.gmra.mrb[12].mxu0 %v531_v36  ;;  %397 = vmatmul.mubr.bf16.gmra.mrb[12].mxu1 %v531_v36 }
  0xf5   :  { %v295_v48 = vpop.f32.mrb[0].mxu0  ;;  %v368_v49 = vpop.f32.mrb[0].mxu1 }
  0xf6   :  { %v296_v50 = vadd.f32 %v295_v48, %v672_v44  ;;  %v369_v51 = vadd.f32 %v368_v49, %v674_v45  ;;  %v297_v52 = vpop.f32.mrb[1].mxu0  ;;  %v370_v53 = vpop.f32.mrb[1].mxu1 }
  0xf7   :  { %v298_v54 = vadd.f32 %v297_v52, %v676_v46  ;;  %v371_v55 = vadd.f32 %v370_v53, %v678_v47  ;;  %v299_v56 = vpop.f32.mrb[2].mxu0  ;;  %v372_v57 = vpop.f32.mrb[2].mxu1 }
  0xf8   :  { %407 = vst [vmem:[%s811_s3] sm:$0xff] %v296_v50  ;;  %409 = vst [vmem:[%s811_s3 + $0x10] sm:$0xff] %v369_v51  ;;  %v300_v58 = vadd.f32 %v299_v56, %v672_v44  ;;  %v373_v59 = vadd.f32 %v372_v57, %v674_v45  ;;  %v301_v60 = vpop.f32.mrb[3].mxu0  ;;  %v374_v61 = vpop.f32.mrb[3].mxu1 }
  0xf9   :  { %408 = vst [vmem:[%s811_s3 + $0x8] sm:$0xff] %v298_v54  ;;  %410 = vst [vmem:[%s811_s3 + $0x18] sm:$0xff] %v371_v55  ;;  %v302_v62 = vadd.f32 %v301_v60, %v676_v46  ;;  %v375_v63 = vadd.f32 %v374_v61, %v678_v47 }
  0xfa   :  { %411 = vst [vmem:[%s811_s3 + $0x20] sm:$0xff] %v300_v58  ;;  %413 = vst [vmem:[%s811_s3 + $0x30] sm:$0xff] %v373_v59 }
  0xfb   :  { %412 = vst [vmem:[%s811_s3 + $0x28] sm:$0xff] %v302_v62  ;;  %414 = vst [vmem:[%s811_s3 + $0x38] sm:$0xff] %v375_v63 }
  0xfd   :  { %v305_v0 = vpop.f32.mrb[4].mxu0  ;;  %v378_v1 = vpop.f32.mrb[4].mxu1 }
  0xfe   :  { %v306_v2 = vadd.f32 %v305_v0, %v672_v44  ;;  %v379_v3 = vadd.f32 %v378_v1, %v674_v45  ;;  %v307_v4 = vpop.f32.mrb[5].mxu0  ;;  %v380_v5 = vpop.f32.mrb[5].mxu1 }
  0xff   :  { %v308_v6 = vadd.f32 %v307_v4, %v676_v46  ;;  %v381_v7 = vadd.f32 %v380_v5, %v678_v47  ;;  %v309_v8 = vpop.f32.mrb[6].mxu0  ;;  %v382_v9 = vpop.f32.mrb[6].mxu1 }
 0x100   :  { %415 = vst [vmem:[%s811_s3 + $0x40] sm:$0xff] %v306_v2  ;;  %417 = vst [vmem:[%s811_s3 + $0x50] sm:$0xff] %v379_v3  ;;  %v310_v10 = vadd.f32 %v309_v8, %v672_v44  ;;  %v383_v11 = vadd.f32 %v382_v9, %v674_v45  ;;  %v311_v12 = vpop.f32.mrb[7].mxu0  ;;  %v384_v13 = vpop.f32.mrb[7].mxu1 }
 0x101   :  { %416 = vst [vmem:[%s811_s3 + $0x48] sm:$0xff] %v308_v6  ;;  %418 = vst [vmem:[%s811_s3 + $0x58] sm:$0xff] %v381_v7  ;;  %v312_v14 = vadd.f32 %v311_v12, %v676_v46  ;;  %v385_v15 = vadd.f32 %v384_v13, %v678_v47 }
 0x102   :  { %419 = vst [vmem:[%s811_s3 + $0x60] sm:$0xff] %v310_v10  ;;  %421 = vst [vmem:[%s811_s3 + $0x70] sm:$0xff] %v383_v11 }
 0x103   :  { %420 = vst [vmem:[%s811_s3 + $0x68] sm:$0xff] %v312_v14  ;;  %422 = vst [vmem:[%s811_s3 + $0x78] sm:$0xff] %v385_v15 }
 0x105   :  { %v315_v16 = vpop.f32.mrb[8].mxu0  ;;  %v388_v17 = vpop.f32.mrb[8].mxu1 }
 0x106   :  { %v316_v18 = vadd.f32 %v315_v16, %v672_v44  ;;  %v389_v19 = vadd.f32 %v388_v17, %v674_v45  ;;  %v317_v20 = vpop.f32.mrb[9].mxu0  ;;  %v390_v21 = vpop.f32.mrb[9].mxu1 }
 0x107   :  { %v318_v22 = vadd.f32 %v317_v20, %v676_v46  ;;  %v391_v23 = vadd.f32 %v390_v21, %v678_v47  ;;  %v319_v24 = vpop.f32.mrb[10].mxu0  ;;  %v392_v25 = vpop.f32.mrb[10].mxu1 }
 0x108   :  { %423 = vst [vmem:[%s811_s3 + $0x80] sm:$0xff] %v316_v18  ;;  %425 = vst [vmem:[%s811_s3 + $0x90] sm:$0xff] %v389_v19  ;;  %v320_v26 = vadd.f32 %v319_v24, %v672_v44  ;;  %v393_v27 = vadd.f32 %v392_v25, %v674_v45  ;;  %v321_v28 = vpop.f32.mrb[11].mxu0  ;;  %v394_v29 = vpop.f32.mrb[11].mxu1 }
 0x109   :  { %424 = vst [vmem:[%s811_s3 + $0x88] sm:$0xff] %v318_v22  ;;  %426 = vst [vmem:[%s811_s3 + $0x98] sm:$0xff] %v391_v23  ;;  %v322_v30 = vadd.f32 %v321_v28, %v676_v46  ;;  %v395_v31 = vadd.f32 %v394_v29, %v678_v47 }
 0x10a   :  { %427 = vst [vmem:[%s811_s3 + $0xa0] sm:$0xff] %v320_v26  ;;  %429 = vst [vmem:[%s811_s3 + $0xb0] sm:$0xff] %v393_v27 }
 0x10b   :  { %428 = vst [vmem:[%s811_s3 + $0xa8] sm:$0xff] %v322_v30  ;;  %430 = vst [vmem:[%s811_s3 + $0xb8] sm:$0xff] %v395_v31 }
 0x10d   :  { %v325_v32 = vpop.f32.mrb[12].mxu0  ;;  %v398_v33 = vpop.f32.mrb[12].mxu1 }
 0x10e   :  { %v326_v34 = vadd.f32 %v325_v32, %v672_v44  ;;  %v399_v35 = vadd.f32 %v398_v33, %v674_v45  ;;  %v327_v36 = vpop.f32.mrb[13].mxu0  ;;  %v400_v37 = vpop.f32.mrb[13].mxu1 }
 0x10f   :  { %v328_v38 = vadd.f32 %v327_v36, %v676_v46  ;;  %v401_v39 = vadd.f32 %v400_v37, %v678_v47  ;;  %v329_v40 = vpop.f32.mrb[14].mxu0  ;;  %v402_v41 = vpop.f32.mrb[14].mxu1 }
 0x110   :  { %431 = vst [vmem:[%s811_s3 + $0xc0] sm:$0xff] %v326_v34  ;;  %433 = vst [vmem:[%s811_s3 + $0xd0] sm:$0xff] %v399_v35  ;;  %v330_v42 = vadd.f32 %v329_v40, %v672_v44  ;;  %v403_v43 = vadd.f32 %v402_v41, %v674_v45  ;;  %v331_v48 = vpop.f32.mrb[15].mxu0  ;;  %v404_v49 = vpop.f32.mrb[15].mxu1 }
 0x111   :  { %432 = vst [vmem:[%s811_s3 + $0xc8] sm:$0xff] %v328_v38  ;;  %434 = vst [vmem:[%s811_s3 + $0xd8] sm:$0xff] %v401_v39  ;;  %v332_v50 = vadd.f32 %v331_v48, %v676_v46  ;;  %v405_v51 = vadd.f32 %v404_v49, %v678_v47 }
 0x112   :  { %435 = vst [vmem:[%s811_s3 + $0xe0] sm:$0xff] %v330_v42  ;;  %437 = vst [vmem:[%s811_s3 + $0xf0] sm:$0xff] %v403_v43 }
 0x113   :  { %436 = vst [vmem:[%s811_s3 + $0xe8] sm:$0xff] %v332_v50  ;;  %438 = vst [vmem:[%s811_s3 + $0xf8] sm:$0xff] %v405_v51 }

// kernel: dkt_forward.5
= control target key start
LH: loop header
LB: loop body
LE: loop exit
PB: predicated region body
PF: predicated region fallthrough
CT: control target
= control target key end

     0   :  { %s443_s1 = inlined_call_operand.vmem [shape: bf16[128,128], index: 1, kind: input, shape index: {}]   ;;  %s444_s0 = inlined_call_operand.vmem [shape: bf16[64,128], index: 0, kind: input, shape index: {}]   ;;  %s445_s2 = inlined_call_operand.vmem [shape: f32[1,128], index: 2, kind: input, shape index: {}]   ;;  %s446_s3 = inlined_call_operand.vmem [shape: f32[64,128], index: 3, kind: output, shape index: {}]  }
   0x1   :  { %v316_v0 = vld [vmem:[%s443_s1] sm:$0xff]   ;;  %v317_v1 = vld [vmem:[%s443_s1 + $0x8] sm:$0xff]   ;;  %v318_v2 = vld [vmem:[%s443_s1 + $0x10] sm:$0xff]  }
   0x2   :  { %276 = vmatprep.subr.bf16.mxu0 %v316_v0  ;;  %300 = vmatprep.subr.bf16.mxu1 %v316_v0  ;;  %v319_v3 = vld [vmem:[%s443_s1 + $0x18] sm:$0xff]   ;;  %v324_v4 = vld [vmem:[%s444_s0] sm:$0xff]   ;;  %v325_v5 = vld [vmem:[%s444_s0 + $0x10] sm:$0xff]  }
   0x3   :  { %277 = vmatpush3.bf16.msra.mxu0 %v316_v0  ;;  %308 = vmatpush3.bf16.msra.mxu1 %v316_v0  ;;  %v320_v6 = vld [vmem:[%s443_s1 + $0x20] sm:$0xff]   ;;  %v321_v7 = vld [vmem:[%s443_s1 + $0x28] sm:$0xff]   ;;  %v322_v8 = vld [vmem:[%s443_s1 + $0x30] sm:$0xff]  }
   0x4   :  { %278 = vmatprep.subr.bf16.mxu0 %v317_v1  ;;  %301 = vmatprep.subr.bf16.mxu1 %v317_v1  ;;  %v323_v9 = vld [vmem:[%s443_s1 + $0x38] sm:$0xff]   ;;  %v326_v10 = vld [vmem:[%s444_s0 + $0x8] sm:$0xff]   ;;  %v243_v12 = vld [vmem:[%s445_s2] ss:$0 sm:$0xff] }
   0x5   :  { %292 = vmatprep.mubr.bf16.mxu0 %v324_v4  ;;  %296 = vmatprep.mubr.bf16.mxu1 %v325_v5  ;;  %v327_v11 = vld [vmem:[%s444_s0 + $0x18] sm:$0xff]  }
   0x7   :  { %279 = vmatpush3.bf16.msra.mxu0 %v317_v1  ;;  %309 = vmatpush3.bf16.msra.mxu1 %v317_v1 }
   0x8   :  { %280 = vmatprep.subr.bf16.mxu0 %v318_v2  ;;  %302 = vmatprep.subr.bf16.mxu1 %v318_v2 }
   0xb   :  { %281 = vmatpush3.bf16.msra.mxu0 %v318_v2  ;;  %310 = vmatpush3.bf16.msra.mxu1 %v318_v2 }
   0xc   :  { %282 = vmatprep.subr.bf16.mxu0 %v319_v3  ;;  %303 = vmatprep.subr.bf16.mxu1 %v319_v3 }
   0xf   :  { %283 = vmatpush3.bf16.msra.mxu0 %v319_v3  ;;  %311 = vmatpush3.bf16.msra.mxu1 %v319_v3 }
  0x10   :  { %284 = vmatprep.subr.bf16.mxu0 %v320_v6  ;;  %304 = vmatprep.subr.bf16.mxu1 %v320_v6 }
  0x13   :  { %285 = vmatpush3.bf16.msra.mxu0 %v320_v6  ;;  %312 = vmatpush3.bf16.msra.mxu1 %v320_v6 }
  0x14   :  { %286 = vmatprep.subr.bf16.mxu0 %v321_v7  ;;  %305 = vmatprep.subr.bf16.mxu1 %v321_v7 }
  0x17   :  { %287 = vmatpush3.bf16.msra.mxu0 %v321_v7  ;;  %313 = vmatpush3.bf16.msra.mxu1 %v321_v7 }
  0x18   :  { %288 = vmatprep.subr.bf16.mxu0 %v322_v8  ;;  %306 = vmatprep.subr.bf16.mxu1 %v322_v8 }
  0x1b   :  { %289 = vmatpush3.bf16.msra.mxu0 %v322_v8  ;;  %314 = vmatpush3.bf16.msra.mxu1 %v322_v8 }
  0x1c   :  { %290 = vmatprep.subr.bf16.mxu0 %v323_v9  ;;  %307 = vmatprep.subr.bf16.mxu1 %v323_v9 }
  0x1f   :  { %291 = vmatpush3.bf16.msra.mxu0 %v323_v9  ;;  %315 = vmatpush3.bf16.msra.mxu1 %v323_v9 }
  0x22   :  { %293 = vmatmul.mubr.bf16.vlgmr.msra.gmra.mrb[0].mxu0 %v326_v10  ;;  %297 = vmatmul.mubr.bf16.vlgmr.msra.gmra.mrb[0].mxu1 %v327_v11 }
  0xf5   :  { %v294_v13 = vpop.f32.mrb[0].mxu0  ;;  %v298_v14 = vpop.f32.mrb[0].mxu1 }
  0xf6   :  { %v161_v15 = vadd.f32 %v294_v13, %v243_v12  ;;  %v177_v16 = vadd.f32 %v298_v14, %v243_v12  ;;  %v152_v17 = vpop.f32.mrb[1].mxu0  ;;  %v168_v18 = vpop.f32.mrb[1].mxu1 }
  0xf7   :  { %v153_v19 = vadd.f32 %v243_v12, %v152_v17  ;;  %v169_v20 = vadd.f32 %v243_v12, %v168_v18  ;;  %v295_v21 = vpop.f32.mrb[2].mxu0  ;;  %v299_v22 = vpop.f32.mrb[2].mxu1 }
  0xf8   :  { %v258_v23 = vmul.f32 -1.442695, %v161_v15  ;;  %v262_v24 = vmul.f32 -1.442695, %v177_v16  ;;  %v164_v25 = vadd.f32 %v295_v21, %v243_v12  ;;  %v180_v26 = vadd.f32 %v299_v22, %v243_v12  ;;  %v155_v27 = vpop.f32.mrb[3].mxu0  ;;  %v171_v28 = vpop.f32.mrb[3].mxu1 }
  0xf9   :  { %v256_v29 = vmul.f32 -1.442695, %v153_v19  ;;  %v260_v30 = vmul.f32 -1.442695, %v169_v20  ;;  %v156_v31 = vadd.f32 %v243_v12, %v155_v27  ;;  %v172_v32 = vadd.f32 %v243_v12, %v171_v28 }
  0xfa   :  { %328 = vpow2.f32 %v258_v23  ;;  %v259_v33 = vmul.f32 -1.442695, %v164_v25  ;;  %v263_v34 = vmul.f32 -1.442695, %v180_v26 }
  0xfb   :  { %330 = vpow2.f32 %v262_v24  ;;  %v257_v35 = vmul.f32 -1.442695, %v156_v31  ;;  %v261_v36 = vmul.f32 -1.442695, %v172_v32 }
  0xfc   :  { %332 = vpow2.f32 %v256_v29 }
  0xfd   :  { %334 = vpow2.f32 %v260_v30 }
  0xfe   :  { %336 = vpow2.f32 %v259_v33 }
  0xff   :  { %338 = vpow2.f32 %v263_v34 }
 0x100   :  { %340 = vpow2.f32 %v257_v35 }
 0x101   :  { %342 = vpow2.f32 %v261_v36 }
 0x104   :  { %v329_v37 = vpop.eup %328 }
 0x105   :  { %v331_v38 = vpop.eup %330  ;;  %v209_v39 = vadd.f32 1.0, %v329_v37 }
 0x106   :  { %v333_v40 = vpop.eup %332  ;;  %v213_v41 = vadd.f32 1.0, %v331_v38 }
 0x107   :  { %v335_v42 = vpop.eup %334  ;;  %344 = vrcp.f32 %v209_v39  ;;  %v207_v43 = vadd.f32 1.0, %v333_v40 }
 0x108   :  { %v337_v44 = vpop.eup %336  ;;  %346 = vrcp.f32 %v213_v41  ;;  %v211_v45 = vadd.f32 1.0, %v335_v42 }
 0x109   :  { %v339_v46 = vpop.eup %338  ;;  %348 = vrcp.f32 %v207_v43  ;;  %v210_v47 = vadd.f32 1.0, %v337_v44 }
 0x10a   :  { %v341_v48 = vpop.eup %340  ;;  %350 = vrcp.f32 %v211_v45  ;;  %v214_v49 = vadd.f32 1.0, %v339_v46 }
 0x10b   :  { %v343_v50 = vpop.eup %342  ;;  %352 = vrcp.f32 %v210_v47  ;;  %v208_v51 = vadd.f32 1.0, %v341_v48 }
 0x10c   :  { %354 = vrcp.f32 %v214_v49  ;;  %v212_v52 = vadd.f32 1.0, %v343_v50 }
 0x10d   :  { %356 = vrcp.f32 %v208_v51 }
 0x10e   :  { %358 = vrcp.f32 %v212_v52 }
 0x111   :  { %v345_v53 = vpop.eup %344 }
 0x112   :  { %v347_v54 = vpop.eup %346  ;;  %233 = vst [vmem:[%s446_s3 + $0x10] sm:$0xff] %v345_v53 }
 0x113   :  { %v349_v55 = vpop.eup %348  ;;  %237 = vst [vmem:[%s446_s3 + $0x30] sm:$0xff] %v347_v54 }
 0x114   :  { %v351_v56 = vpop.eup %350  ;;  %231 = vst [vmem:[%s446_s3] sm:$0xff] %v349_v55 }
 0x115   :  { %v353_v57 = vpop.eup %352  ;;  %235 = vst [vmem:[%s446_s3 + $0x20] sm:$0xff] %v351_v56 }
 0x116   :  { %v355_v58 = vpop.eup %354  ;;  %234 = vst [vmem:[%s446_s3 + $0x18] sm:$0xff] %v353_v57 }
 0x117   :  { %v357_v59 = vpop.eup %356  ;;  %238 = vst [vmem:[%s446_s3 + $0x38] sm:$0xff] %v355_v58 }
 0x118   :  { %v359_v60 = vpop.eup %358  ;;  %232 = vst [vmem:[%s446_s3 + $0x8] sm:$0xff] %v357_v59 }
 0x119   :  { %236 = vst [vmem:[%s446_s3 + $0x28] sm:$0xff] %v359_v60 }

// kernel: dkt_forward.4
= control target key start
LH: loop header
LB: loop body
LE: loop exit
PB: predicated region body
PF: predicated region fallthrough
CT: control target
= control target key end

     0   :  { %v3130_v1 = vmov 0   ;;  %s3945_s1 = inlined_call_operand.vmem [shape: bf16[128,512], index: 1, kind: input, shape index: {}]   ;;  %s3946_s0 = inlined_call_operand.vmem [shape: f32[8,8,512], index: 0, kind: input, shape index: {}]   ;;  %s3947_s2 = inlined_call_operand.vmem [shape: bf16[8,8,128], index: 2, kind: output, shape index: {}]  }
   0x1   :  { %v3151_v0 = vld [vmem:[%s3945_s1 + $0x4] ss:$16 sps:$4 sm:$0xff]   ;;  %247 = vmatprep.mubr.bf16.mxu0 %v3130_v1  ;;  %16 = vst [vmem:[#allocation2] sm:$0xf] %v3130_v1  ;;  %288 = vmatprep.mubr.bf16.mxu1 %v3130_v1  ;;  %v3159_v2 = vld [vmem:[%s3945_s1] ss:$16 sps:$4 sm:$0xff]  }
   0x2   :  { %215 = vmatprep.subr.bf16.mxu0 %v3151_v0  ;;  %v3165_v3 = vld [vmem:[%s3945_s1 + $0x24] ss:$16 sps:$4 sm:$0xff]   ;;  %v3171_v4 = vld [vmem:[%s3945_s1 + $0xc] ss:$16 sps:$4 sm:$0xff]   ;;  %v3176_v5 = vld [vmem:[%s3945_s1 + $0x20] ss:$16 sps:$4 sm:$0xff]  }
   0x3   :  { %216 = vmatpush1.bf16.msra.mxu0 %v3159_v2  ;;  %v3181_v6 = vld [vmem:[%s3945_s1 + $0x8] ss:$16 sps:$4 sm:$0xff]   ;;  %v3187_v7 = vld [vmem:[%s3945_s1 + $0x44] ss:$16 sps:$4 sm:$0xff]   ;;  %256 = vmatprep.subr.bf16.mxu1 %v3171_v4  ;;  %v3193_v8 = vld [vmem:[%s3945_s1 + $0x2c] ss:$16 sps:$4 sm:$0xff]  }
   0x4   :  { %217 = vmatprep.subr.bf16.mxu0 %v3165_v3  ;;  %257 = vmatpush1.bf16.msra.mxu1 %v3181_v6  ;;  %v3199_v9 = vld [vmem:[%s3945_s1 + $0x28] ss:$16 sps:$4 sm:$0xff]   ;;  %v3206_v10 = vld [vmem:[%s3945_s1 + $0x40] ss:$16 sps:$4 sm:$0xff]   ;;  %v3212_v11 = vld [vmem:[%s3945_s1 + $0x64] ss:$16 sps:$4 sm:$0xff]  }
   0x5   :  { %258 = vmatprep.subr.bf16.mxu1 %v3193_v8  ;;  %v3217_v12 = vld [vmem:[%s3945_s1 + $0x4c] ss:$16 sps:$4 sm:$0xff]   ;;  %v3223_v13 = vld [vmem:[%s3945_s1 + $0x48] ss:$16 sps:$4 sm:$0xff]   ;;  %v3230_v14 = vld [vmem:[%s3945_s1 + $0x60] ss:$16 sps:$4 sm:$0xff]  }
   0x6   :  { %v3235_v15 = vld [vmem:[%s3945_s1 + $0x6c] ss:$16 sps:$4 sm:$0xff]   ;;  %v3241_v16 = vld [vmem:[%s3945_s1 + $0x84] ss:$16 sps:$4 sm:$0xff]   ;;  %v3247_v17 = vld [vmem:[%s3945_s1 + $0x80] ss:$16 sps:$4 sm:$0xff]  }
   0x7   :  { %218 = vmatpush1.bf16.msra.mxu0 %v3176_v5  ;;  %v3252_v18 = vld [vmem:[%s3945_s1 + $0x68] ss:$16 sps:$4 sm:$0xff]   ;;  %v3259_v19 = vld [vmem:[%s3945_s1 + $0x8c] ss:$16 sps:$4 sm:$0xff]   ;;  %v3265_v20 = vld [vmem:[%s3945_s1 + $0xa4] ss:$16 sps:$4 sm:$0xff]  }
   0x8   :  { %219 = vmatprep.subr.bf16.mxu0 %v3187_v7  ;;  %259 = vmatpush1.bf16.msra.mxu1 %v3199_v9  ;;  %v3271_v21 = vld [vmem:[%s3945_s1 + $0x88] ss:$16 sps:$4 sm:$0xff]   ;;  %v3278_v22 = vld [vmem:[%s3945_s1 + $0xa0] ss:$16 sps:$4 sm:$0xff]   ;;  %v3283_v23 = vld [vmem:[%s3945_s1 + $0xac] ss:$16 sps:$4 sm:$0xff]  }
   0x9   :  { %260 = vmatprep.subr.bf16.mxu1 %v3217_v12  ;;  %v3289_v24 = vld [vmem:[%s3945_s1 + $0xc4] ss:$16 sps:$4 sm:$0xff]   ;;  %v3294_v25 = vld [vmem:[%s3945_s1 + $0xc0] ss:$16 sps:$4 sm:$0xff]   ;;  %v3299_v26 = vld [vmem:[%s3945_s1 + $0xa8] ss:$16 sps:$4 sm:$0xff]  }
   0xa   :  { %v3304_v27 = vld [vmem:[%s3945_s1 + $0xcc] ss:$16 sps:$4 sm:$0xff]   ;;  %v3310_v28 = vld [vmem:[%s3945_s1 + $0xe4] ss:$16 sps:$4 sm:$0xff]   ;;  %v3318_v29 = vld [vmem:[%s3945_s1 + $0xc8] ss:$16 sps:$4 sm:$0xff]  }
   0xb   :  { %220 = vmatpush1.bf16.msra.mxu0 %v3206_v10  ;;  %v3323_v30 = vld [vmem:[%s3945_s1 + $0xe0] ss:$16 sps:$4 sm:$0xff]   ;;  %v3328_v31 = vld [vmem:[%s3945_s1 + $0xec] ss:$16 sps:$4 sm:$0xff]   ;;  %v3337_v32 = vld [vmem:[%s3945_s1 + $0xe8] ss:$16 sps:$4 sm:$0xff]  }
   0xc   :  { %221 = vmatprep.subr.bf16.mxu0 %v3212_v11  ;;  %261 = vmatpush1.bf16.msra.mxu1 %v3223_v13  ;;  %v22_v33 = vld [vmem:[#allocation2] sm:$0xf]  ;;  %v19_v35 = vld [vmem:[%s3946_s0 + $0x8] sm:$0xff]  ;;  %v20_v39 = vld [vmem:[%s3946_s0 + $0x10] sm:$0xff] }
   0xd   :  { %262 = vmatprep.subr.bf16.mxu1 %v3235_v15  ;;  %v18_v34 = vld [vmem:[%s3946_s0] sm:$0xff]  ;;  %v21_v49 = vld [vmem:[%s3946_s0 + $0x18] sm:$0xff] }
   0xf   :  { %222 = vmatpush1.bf16.msra.mxu0 %v3230_v14 }
  0x10   :  { %223 = vmatprep.subr.bf16.mxu0 %v3241_v16  ;;  %263 = vmatpush1.bf16.msra.mxu1 %v3252_v18 }
  0x11   :  { %264 = vmatprep.subr.bf16.mxu1 %v3259_v19 }
  0x13   :  { %224 = vmatpush1.bf16.msra.mxu0 %v3247_v17 }
  0x14   :  { %225 = vmatprep.subr.bf16.mxu0 %v3265_v20  ;;  %265 = vmatpush1.bf16.msra.mxu1 %v3271_v21 }
  0x15   :  { %266 = vmatprep.subr.bf16.mxu1 %v3283_v23 }
  0x17   :  { %226 = vmatpush1.bf16.msra.mxu0 %v3278_v22 }
  0x18   :  { %227 = vmatprep.subr.bf16.mxu0 %v3289_v24  ;;  %267 = vmatpush1.bf16.msra.mxu1 %v3299_v26 }
  0x19   :  { %268 = vmatprep.subr.bf16.mxu1 %v3304_v27 }
  0x1b   :  { %228 = vmatpush1.bf16.msra.mxu0 %v3294_v25 }
  0x1c   :  { %229 = vmatprep.subr.bf16.mxu0 %v3310_v28  ;;  %269 = vmatpush1.bf16.msra.mxu1 %v3318_v29 }
  0x1d   :  { %270 = vmatprep.subr.bf16.mxu1 %v3328_v31 }
  0x1f   :  { %230 = vmatpush1.bf16.msra.mxu0 %v3323_v30 }
  0x20   :  { %522 = vmatprep.subr.bf16.mxu0 %v3151_v0  ;;  %271 = vmatpush1.bf16.msra.mxu1 %v3337_v32 }
  0x21   :  { %563 = vmatprep.subr.bf16.mxu1 %v3171_v4 }
  0x22   :  { %248 = vmatmul.mubr.bf16.vlgmr.msra.gmra.mrb[0].mxu0 %v22_v33 }
  0x23   :  { %523 = vmatpush1.bf16.msra.mxu0 %v3159_v2  ;;  %554 = vmatprep.mubr.bf16.mxu0 %v3130_v1 }
  0x24   :  { %524 = vmatprep.subr.bf16.mxu0 %v3165_v3  ;;  %289 = vmatmul.mubr.bf16.vlgmr.msra.gmra.mrb[0].mxu1 %v22_v33 }
  0x25   :  { %564 = vmatpush1.bf16.msra.mxu1 %v3181_v6  ;;  %595 = vmatprep.mubr.bf16.mxu1 %v3130_v1 }
  0x26   :  { %565 = vmatprep.subr.bf16.mxu1 %v3193_v8 }
  0x27   :  { %525 = vmatpush1.bf16.msra.mxu0 %v3176_v5 }
  0x28   :  { %526 = vmatprep.subr.bf16.mxu0 %v3187_v7 }
  0x29   :  { %566 = vmatpush1.bf16.msra.mxu1 %v3199_v9 }
  0x2a   :  { %567 = vmatprep.subr.bf16.mxu1 %v3217_v12 }
  0x2b   :  { %527 = vmatpush1.bf16.msra.mxu0 %v3206_v10 }
  0x2c   :  { %528 = vmatprep.subr.bf16.mxu0 %v3212_v11 }
  0x2d   :  { %568 = vmatpush1.bf16.msra.mxu1 %v3223_v13 }
  0x2e   :  { %569 = vmatprep.subr.bf16.mxu1 %v3235_v15 }
  0x2f   :  { %529 = vmatpush1.bf16.msra.mxu0 %v3230_v14 }
  0x30   :  { %530 = vmatprep.subr.bf16.mxu0 %v3241_v16 }
  0x31   :  { %570 = vmatpush1.bf16.msra.mxu1 %v3252_v18 }
  0x32   :  { %571 = vmatprep.subr.bf16.mxu1 %v3259_v19 }
  0x33   :  { %531 = vmatpush1.bf16.msra.mxu0 %v3247_v17 }
  0x34   :  { %532 = vmatprep.subr.bf16.mxu0 %v3265_v20 }
  0x35   :  { %572 = vmatpush1.bf16.msra.mxu1 %v3271_v21 }
  0x36   :  { %573 = vmatprep.subr.bf16.mxu1 %v3283_v23 }
  0x37   :  { %533 = vmatpush1.bf16.msra.mxu0 %v3278_v22 }
  0x38   :  { %534 = vmatprep.subr.bf16.mxu0 %v3289_v24 }
  0x39   :  { %574 = vmatpush1.bf16.msra.mxu1 %v3299_v26 }
  0x3a   :  { %575 = vmatprep.subr.bf16.mxu1 %v3304_v27 }
  0x3b   :  { %535 = vmatpush1.bf16.msra.mxu0 %v3294_v25 }
  0x3c   :  { %536 = vmatprep.subr.bf16.mxu0 %v3310_v28 }
  0x3d   :  { %576 = vmatpush1.bf16.msra.mxu1 %v3318_v29 }
  0x3e   :  { %577 = vmatprep.subr.bf16.mxu1 %v3328_v31 }
  0x3f   :  { %537 = vmatpush1.bf16.msra.mxu0 %v3323_v30 }
  0x40   :  { %830 = vmatprep.subr.bf16.mxu0 %v3151_v0 }
  0x41   :  { %578 = vmatpush1.bf16.msra.mxu1 %v3337_v32 }
  0x42   :  { %871 = vmatprep.subr.bf16.mxu1 %v3171_v4 }
  0xf5   :  { %v249_v36 = vpop.f32.mrb[0].mxu0 }
  0xf6   :  { %v297_v37 = vadd.f32 %v249_v36, %v18_v34  ;;  %v251_v38 = vpop.f32.mrb[1].mxu0 }
  0xf7   :  { %v298_v40 = vadd.f32 %v251_v38, %v19_v35  ;;  %v253_v41 = vpop.f32.mrb[2].mxu0  ;;  %v290_v44 = vpop.f32.mrb[0].mxu1 }
  0xf8   :  { %v301_v42 = vmul.f32 0.5, %v297_v37  ;;  %v254_v43 = vpop.f32.mrb[3].mxu0  ;;  %v299_v46 = vadd.f32 %v290_v44, %v20_v39  ;;  %v292_v47 = vpop.f32.mrb[1].mxu1  ;;  %v2676_v39 = vld [vmem:[%s3946_s0 + $0x20] sm:$0xff] }
  0xf9   :  { %v305_v45 = vmul.f32 0.5, %v298_v40  ;;  %v294_v48 = vpop.f32.mrb[2].mxu1  ;;  %v300_v51 = vadd.f32 %v292_v47, %v21_v49  ;;  %v2677_v40 = vld [vmem:[%s3946_s0 + $0x28] sm:$0xff] }
  0xfa   :  { %3050 = vtanh.f32 %v301_v42  ;;  %v295_v50 = vpop.f32.mrb[3].mxu1 }
  0xfb   :  { %3052 = vtanh.f32 %v305_v45  ;;  %v310_v52 = vmul.f32 0.5, %v300_v51 }
  0xfc   :  { %3054 = vtanh.f32 %v299_v46  ;;  %v2678_v46 = vld [vmem:[%s3946_s0 + $0x30] sm:$0xff] }
  0xfd   :  { %3056 = vtanh.f32 %v310_v52 }
 0x104   :  { %v3051_v53 = vpop.eup %3050 }
 0x105   :  { %v3053_v54 = vpop.eup %3052  ;;  %v303_v55 = vmul.f32 0.5, %v3051_v53  ;;  %v2679_v53 = vld [vmem:[%s3946_s0 + $0x38] sm:$0xff] }
 0x106   :  { %v3055_v56 = vpop.eup %3054  ;;  %v307_v57 = vmul.f32 0.5, %v3053_v54 }
 0x107   :  { %v304_v58 = vadd.f32 0.5, %v303_v55  ;;  %v3057_v63 = vpop.eup %3056 }
 0x108   :  { %v308_v59 = vadd.f32 0.5, %v307_v57  ;;  %v312_v33 = vmul.f32 0.5, %v3057_v63 }
 0x109   :  { %v316_v60 = vmul.f32 %v3055_v56, %v304_v58 }
 0x10a   :  { %v315_v61 = vmul.f32 0.0, %v308_v59  ;;  %v313_v34 = vadd.f32 0.5, %v312_v33 }
 0x10c   :  { %v3391_v62 = vadd.f32 %v316_v60, %v315_v61 }
 0x10e   :  { %3058 = vtanh.f32 %v3391_v62 }
 0x118   :  { %v3059_v35 = vpop.eup %3058 }
 0x119   :  { %v3394_v36 = vmul.f32 %v3059_v35, %v313_v34 }
 0x11b   :  { %v321_v37 = vpack.c.bf16 %v3394_v36, %v3394_v36 }
 0x11d   :  { %322 = vst [vmem:[#allocation2] sm:$0xf] %v321_v37 }
 0x124   :  { %v329_v38 = vld [vmem:[#allocation2] sm:$0xf] }
 0x125   :  { %555 = vmatmul.mubr.bf16.vlgmr.msra.gmra.mrb[4].mxu0 %v329_v38  ;;  %596 = vmatmul.mubr.bf16.vlgmr.msra.gmra.mrb[4].mxu1 %v329_v38 }
 0x126   :  { %831 = vmatpush1.bf16.msra.mxu0 %v3159_v2  ;;  %872 = vmatpush1.bf16.msra.mxu1 %v3181_v6 }
 0x127   :  { %832 = vmatprep.subr.bf16.mxu0 %v3165_v3  ;;  %873 = vmatprep.subr.bf16.mxu1 %v3193_v8 }
 0x128   :  { %862 = vmatprep.mubr.bf16.mxu0 %v3130_v1  ;;  %903 = vmatprep.mubr.bf16.mxu1 %v3130_v1 }
 0x12a   :  { %833 = vmatpush1.bf16.msra.mxu0 %v3176_v5  ;;  %874 = vmatpush1.bf16.msra.mxu1 %v3199_v9 }
 0x12b   :  { %834 = vmatprep.subr.bf16.mxu0 %v3187_v7  ;;  %875 = vmatprep.subr.bf16.mxu1 %v3217_v12 }
 0x12e   :  { %835 = vmatpush1.bf16.msra.mxu0 %v3206_v10  ;;  %876 = vmatpush1.bf16.msra.mxu1 %v3223_v13 }
 0x12f   :  { %836 = vmatprep.subr.bf16.mxu0 %v3212_v11  ;;  %877 = vmatprep.subr.bf16.mxu1 %v3235_v15 }
 0x132   :  { %837 = vmatpush1.bf16.msra.mxu0 %v3230_v14  ;;  %878 = vmatpush1.bf16.msra.mxu1 %v3252_v18 }
 0x133   :  { %838 = vmatprep.subr.bf16.mxu0 %v3241_v16  ;;  %879 = vmatprep.subr.bf16.mxu1 %v3259_v19 }
 0x136   :  { %839 = vmatpush1.bf16.msra.mxu0 %v3247_v17  ;;  %880 = vmatpush1.bf16.msra.mxu1 %v3271_v21 }
 0x137   :  { %840 = vmatprep.subr.bf16.mxu0 %v3265_v20  ;;  %881 = vmatprep.subr.bf16.mxu1 %v3283_v23 }
 0x13a   :  { %841 = vmatpush1.bf16.msra.mxu0 %v3278_v22  ;;  %882 = vmatpush1.bf16.msra.mxu1 %v3299_v26 }
 0x13b   :  { %842 = vmatprep.subr.bf16.mxu0 %v3289_v24  ;;  %883 = vmatprep.subr.bf16.mxu1 %v3304_v27 }
 0x13e   :  { %843 = vmatpush1.bf16.msra.mxu0 %v3294_v25  ;;  %884 = vmatpush1.bf16.msra.mxu1 %v3318_v29 }
 0x13f   :  { %844 = vmatprep.subr.bf16.mxu0 %v3310_v28  ;;  %885 = vmatprep.subr.bf16.mxu1 %v3328_v31 }
 0x142   :  { %845 = vmatpush1.bf16.msra.mxu0 %v3323_v30  ;;  %886 = vmatpush1.bf16.msra.mxu1 %v3337_v32 }
 0x143   :  { %1138 = vmatprep.subr.bf16.mxu0 %v3151_v0  ;;  %1179 = vmatprep.subr.bf16.mxu1 %v3171_v4 }
 0x1f8   :  { %v556_v41 = vpop.f32.mrb[4].mxu0  ;;  %v597_v42 = vpop.f32.mrb[4].mxu1 }
 0x1f9   :  { %v604_v43 = vadd.f32 %v2676_v39, %v556_v41  ;;  %v558_v44 = vpop.f32.mrb[5].mxu0  ;;  %v599_v45 = vpop.f32.mrb[5].mxu1  ;;  %v606_v52 = vadd.f32 %v2678_v46, %v597_v42 }
 0x1fa   :  { %v605_v0 = vadd.f32 %v2677_v40, %v558_v44  ;;  %v560_v47 = vpop.f32.mrb[6].mxu0  ;;  %v601_v4 = vpop.f32.mrb[6].mxu1  ;;  %v607_v54 = vadd.f32 %v2679_v53, %v599_v45  ;;  %v3543_v53 = vld [vmem:[%s3945_s1 + $0x20] ss:$16 sps:$4 sm:$0xff]  }
 0x1fb   :  { %v608_v48 = vmul.f32 0.5, %v604_v43  ;;  %v561_v49 = vpop.f32.mrb[7].mxu0  ;;  %v602_v50 = vpop.f32.mrb[7].mxu1  ;;  %v3509_v4 = vld [vmem:[%s3945_s1 + $0x4] ss:$16 sps:$4 sm:$0xff]  }
 0x1fc   :  { %v612_v51 = vmul.f32 0.5, %v605_v0  ;;  %v617_v55 = vmul.f32 0.5, %v607_v54  ;;  %v3519_v49 = vld [vmem:[%s3945_s1] ss:$16 sps:$4 sm:$0xff]   ;;  %v3524_v50 = vld [vmem:[%s3945_s1 + $0x8] ss:$16 sps:$4 sm:$0xff]  }
 0x1fd   :  { %3060 = vtanh.f32 %v608_v48  ;;  %v3514_v48 = vld [vmem:[%s3945_s1 + $0xc] ss:$16 sps:$4 sm:$0xff]   ;;  %v3548_v54 = vld [vmem:[%s3945_s1 + $0x28] ss:$16 sps:$4 sm:$0xff]  }
 0x1fe   :  { %3062 = vtanh.f32 %v612_v51  ;;  %v3533_v51 = vld [vmem:[%s3945_s1 + $0x24] ss:$16 sps:$4 sm:$0xff]  }
 0x1ff   :  { %3064 = vtanh.f32 %v606_v52  ;;  %v3538_v52 = vld [vmem:[%s3945_s1 + $0x2c] ss:$16 sps:$4 sm:$0xff]  }
 0x200   :  { %3066 = vtanh.f32 %v617_v55  ;;  %v3557_v55 = vld [vmem:[%s3945_s1 + $0x44] ss:$16 sps:$4 sm:$0xff]  }
 0x207   :  { %v3061_v56 = vpop.eup %3060 }
 0x208   :  { %v3063_v57 = vpop.eup %3062  ;;  %v610_v58 = vmul.f32 0.5, %v3061_v56  ;;  %v3562_v56 = vld [vmem:[%s3945_s1 + $0x4c] ss:$16 sps:$4 sm:$0xff]  }
 0x209   :  { %v614_v59 = vmul.f32 0.5, %v3063_v57  ;;  %v3065_v61 = vpop.eup %3064  ;;  %v3567_v57 = vld [vmem:[%s3945_s1 + $0x40] ss:$16 sps:$4 sm:$0xff]  }
 0x20a   :  { %v611_v60 = vadd.f32 0.5, %v610_v58  ;;  %v3067_v37 = vpop.eup %3066  ;;  %v3572_v58 = vld [vmem:[%s3945_s1 + $0x48] ss:$16 sps:$4 sm:$0xff]  }
 0x20b   :  { %v615_v63 = vadd.f32 0.5, %v614_v59  ;;  %v619_v38 = vmul.f32 0.5, %v3067_v37  ;;  %v3581_v59 = vld [vmem:[%s3945_s1 + $0x64] ss:$16 sps:$4 sm:$0xff]   ;;  %v3620_v37 = vld [vmem:[%s3945_s1 + $0x88] ss:$16 sps:$4 sm:$0xff]  }
 0x20c   :  { %v623_v33 = vmul.f32 %v3065_v61, %v611_v60  ;;  %v3586_v60 = vld [vmem:[%s3945_s1 + $0x6c] ss:$16 sps:$4 sm:$0xff]   ;;  %v3591_v61 = vld [vmem:[%s3945_s1 + $0x60] ss:$16 sps:$4 sm:$0xff]  }
 0x20d   :  { %v622_v34 = vmul.f32 %v615_v63, %v3391_v62  ;;  %v620_v39 = vadd.f32 0.5, %v619_v38  ;;  %v3596_v63 = vld [vmem:[%s3945_s1 + $0x68] ss:$16 sps:$4 sm:$0xff]   ;;  %v3629_v38 = vld [vmem:[%s3945_s1 + $0xa4] ss:$16 sps:$4 sm:$0xff]  }
 0x20f   :  { %v3445_v35 = vadd.f32 %v623_v33, %v622_v34  ;;  %v3605_v33 = vld [vmem:[%s3945_s1 + $0x84] ss:$16 sps:$4 sm:$0xff]   ;;  %v3610_v34 = vld [vmem:[%s3945_s1 + $0x8c] ss:$16 sps:$4 sm:$0xff]  }
 0x211   :  { %3068 = vtanh.f32 %v3445_v35 }
 0x21b   :  { %v3069_v40 = vpop.eup %3068 }
 0x21c   :  { %v3448_v41 = vmul.f32 %v3069_v40, %v620_v39  ;;  %v3634_v39 = vld [vmem:[%s3945_s1 + $0xac] ss:$16 sps:$4 sm:$0xff]   ;;  %v3639_v40 = vld [vmem:[%s3945_s1 + $0xa0] ss:$16 sps:$4 sm:$0xff]  }
 0x21e   :  { %v628_v42 = vpack.c.bf16 %v3448_v41, %v3448_v41 }
 0x220   :  { %629 = vst [vmem:[#allocation2] sm:$0xf] %v628_v42  ;;  %v3644_v42 = vld [vmem:[%s3945_s1 + $0xa8] ss:$16 sps:$4 sm:$0xff]  }
 0x227   :  { %v637_v43 = vld [vmem:[#allocation2] sm:$0xf] }
 0x228   :  { %863 = vmatmul.mubr.bf16.vlgmr.msra.gmra.mrb[8].mxu0 %v637_v43  ;;  %904 = vmatmul.mubr.bf16.vlgmr.msra.gmra.mrb[8].mxu1 %v637_v43  ;;  %v3653_v43 = vld [vmem:[%s3945_s1 + $0xc4] ss:$16 sps:$4 sm:$0xff]  }
 0x229   :  { %1139 = vmatpush1.bf16.msra.mxu0 %v3159_v2  ;;  %1180 = vmatpush1.bf16.msra.mxu1 %v3181_v6  ;;  %v2712_v2 = vld [vmem:[%s3946_s0 + $0x40] sm:$0xff] }
 0x22a   :  { %1140 = vmatprep.subr.bf16.mxu0 %v3165_v3  ;;  %1181 = vmatprep.subr.bf16.mxu1 %v3193_v8  ;;  %v2713_v3 = vld [vmem:[%s3946_s0 + $0x48] sm:$0xff] }
 0x22b   :  { %1170 = vmatprep.mubr.bf16.mxu0 %v3130_v1  ;;  %1211 = vmatprep.mubr.bf16.mxu1 %v3130_v1 }
 0x22d   :  { %1141 = vmatpush1.bf16.msra.mxu0 %v3176_v5  ;;  %1182 = vmatpush1.bf16.msra.mxu1 %v3199_v9 }
 0x22e   :  { %1142 = vmatprep.subr.bf16.mxu0 %v3187_v7  ;;  %1183 = vmatprep.subr.bf16.mxu1 %v3217_v12 }
 0x231   :  { %1143 = vmatpush1.bf16.msra.mxu0 %v3206_v10  ;;  %1184 = vmatpush1.bf16.msra.mxu1 %v3223_v13  ;;  %v2714_v10 = vld [vmem:[%s3946_s0 + $0x50] sm:$0xff] }
 0x232   :  { %1144 = vmatprep.subr.bf16.mxu0 %v3212_v11  ;;  %1185 = vmatprep.subr.bf16.mxu1 %v3235_v15 }
 0x235   :  { %1145 = vmatpush1.bf16.msra.mxu0 %v3230_v14  ;;  %1186 = vmatpush1.bf16.msra.mxu1 %v3252_v18 }
 0x236   :  { %1146 = vmatprep.subr.bf16.mxu0 %v3241_v16  ;;  %1187 = vmatprep.subr.bf16.mxu1 %v3259_v19  ;;  %v2715_v19 = vld [vmem:[%s3946_s0 + $0x58] sm:$0xff] }
 0x239   :  { %1147 = vmatpush1.bf16.msra.mxu0 %v3247_v17  ;;  %1188 = vmatpush1.bf16.msra.mxu1 %v3271_v21 }
 0x23a   :  { %1148 = vmatprep.subr.bf16.mxu0 %v3265_v20  ;;  %1189 = vmatprep.subr.bf16.mxu1 %v3283_v23 }
 0x23d   :  { %1149 = vmatpush1.bf16.msra.mxu0 %v3278_v22  ;;  %1190 = vmatpush1.bf16.msra.mxu1 %v3299_v26 }
 0x23e   :  { %1150 = vmatprep.subr.bf16.mxu0 %v3289_v24  ;;  %1191 = vmatprep.subr.bf16.mxu1 %v3304_v27 }
 0x241   :  { %1151 = vmatpush1.bf16.msra.mxu0 %v3294_v25  ;;  %1192 = vmatpush1.bf16.msra.mxu1 %v3318_v29 }
 0x242   :  { %1152 = vmatprep.subr.bf16.mxu0 %v3310_v28  ;;  %1193 = vmatprep.subr.bf16.mxu1 %v3328_v31 }
 0x245   :  { %1153 = vmatpush1.bf16.msra.mxu0 %v3323_v30  ;;  %1194 = vmatpush1.bf16.msra.mxu1 %v3337_v32 }
 0x246   :  { %1446 = vmatprep.subr.bf16.mxu0 %v3509_v4  ;;  %1487 = vmatprep.subr.bf16.mxu1 %v3514_v48 }
 0x2fb   :  { %v864_v5 = vpop.f32.mrb[8].mxu0  ;;  %v905_v6 = vpop.f32.mrb[8].mxu1 }
 0x2fc   :  { %v912_v7 = vadd.f32 %v2712_v2, %v864_v5  ;;  %v866_v8 = vpop.f32.mrb[9].mxu0  ;;  %v907_v9 = vpop.f32.mrb[9].mxu1  ;;  %v914_v18 = vadd.f32 %v2714_v10, %v905_v6  ;;  %v3658_v2 = vld [vmem:[%s3945_s1 + $0xcc] ss:$16 sps:$4 sm:$0xff]   ;;  %v3668_v5 = vld [vmem:[%s3945_s1 + $0xc8] ss:$16 sps:$4 sm:$0xff]  }
 0x2fd   :  { %v913_v11 = vadd.f32 %v2713_v3, %v866_v8  ;;  %v868_v12 = vpop.f32.mrb[10].mxu0  ;;  %v909_v13 = vpop.f32.mrb[10].mxu1  ;;  %v915_v20 = vadd.f32 %v2715_v19, %v907_v9  ;;  %v3663_v3 = vld [vmem:[%s3945_s1 + $0xc0] ss:$16 sps:$4 sm:$0xff]   ;;  %v3677_v6 = vld [vmem:[%s3945_s1 + $0xe4] ss:$16 sps:$4 sm:$0xff]  }
 0x2fe   :  { %v916_v14 = vmul.f32 0.5, %v912_v7  ;;  %v869_v15 = vpop.f32.mrb[11].mxu0  ;;  %v910_v16 = vpop.f32.mrb[11].mxu1  ;;  %v3682_v7 = vld [vmem:[%s3945_s1 + $0xec] ss:$16 sps:$4 sm:$0xff]   ;;  %v2748_v10 = vld [vmem:[%s3946_s0 + $0x60] sm:$0xff] }
 0x2ff   :  { %v920_v17 = vmul.f32 0.5, %v913_v11  ;;  %v925_v21 = vmul.f32 0.5, %v915_v20  ;;  %v3687_v8 = vld [vmem:[%s3945_s1 + $0xe0] ss:$16 sps:$4 sm:$0xff]   ;;  %v3692_v9 = vld [vmem:[%s3945_s1 + $0xe8] ss:$16 sps:$4 sm:$0xff]  }
 0x300   :  { %3070 = vtanh.f32 %v916_v14  ;;  %v2749_v11 = vld [vmem:[%s3946_s0 + $0x68] sm:$0xff] }
 0x301   :  { %3072 = vtanh.f32 %v920_v17  ;;  %v2750_v17 = vld [vmem:[%s3946_s0 + $0x70] sm:$0xff] }
 0x302   :  { %3074 = vtanh.f32 %v914_v18 }
 0x303   :  { %3076 = vtanh.f32 %v925_v21 }
 0x30a   :  { %v3071_v22 = vpop.eup %3070 }
 0x30b   :  { %v3073_v23 = vpop.eup %3072  ;;  %v918_v24 = vmul.f32 0.5, %v3071_v22 }
 0x30c   :  { %v922_v25 = vmul.f32 0.5, %v3073_v23  ;;  %v3075_v27 = vpop.eup %3074 }
 0x30d   :  { %v919_v26 = vadd.f32 0.5, %v918_v24  ;;  %v3077_v32 = vpop.eup %3076 }
 0x30e   :  { %v923_v28 = vadd.f32 0.5, %v922_v25  ;;  %v927_v62 = vmul.f32 0.5, %v3077_v32 }
 0x30f   :  { %v931_v29 = vmul.f32 %v3075_v27, %v919_v26  ;;  %v2751_v26 = vld [vmem:[%s3946_s0 + $0x78] sm:$0xff] }
 0x310   :  { %v930_v30 = vmul.f32 %v923_v28, %v3445_v35  ;;  %v928_v44 = vadd.f32 0.5, %v927_v62  ;;  %v3615_v35 = vld [vmem:[%s3945_s1 + $0x80] ss:$16 sps:$4 sm:$0xff]  }
 0x312   :  { %v3497_v31 = vadd.f32 %v931_v29, %v930_v30 }
 0x314   :  { %3078 = vtanh.f32 %v3497_v31 }
 0x31e   :  { %v3079_v45 = vpop.eup %3078 }
 0x31f   :  { %v3500_v46 = vmul.f32 %v3079_v45, %v928_v44 }
 0x321   :  { %v936_v0 = vpack.c.bf16 %v3500_v46, %v3500_v46 }
 0x323   :  { %937 = vst [vmem:[#allocation2] sm:$0xf] %v936_v0 }
 0x32a   :  { %v945_v47 = vld [vmem:[#allocation2] sm:$0xf] }
 0x32b   :  { %1171 = vmatmul.mubr.bf16.vlgmr.msra.gmra.mrb[12].mxu0 %v945_v47  ;;  %1212 = vmatmul.mubr.bf16.vlgmr.msra.gmra.mrb[12].mxu1 %v945_v47 }
 0x32c   :  { %1478 = vmatprep.mubr.bf16.mxu0 %v3130_v1  ;;  %1519 = vmatprep.mubr.bf16.mxu1 %v3130_v1 }
 0x32d   :  { %1447 = vmatpush1.bf16.msra.mxu0 %v3519_v49  ;;  %1488 = vmatpush1.bf16.msra.mxu1 %v3524_v50 }
 0x32e   :  { %1448 = vmatprep.subr.bf16.mxu0 %v3533_v51  ;;  %1489 = vmatprep.subr.bf16.mxu1 %v3538_v52 }
 0x331   :  { %1449 = vmatpush1.bf16.msra.mxu0 %v3543_v53  ;;  %1490 = vmatpush1.bf16.msra.mxu1 %v3548_v54 }
 0x332   :  { %1450 = vmatprep.subr.bf16.mxu0 %v3557_v55  ;;  %1491 = vmatprep.subr.bf16.mxu1 %v3562_v56 }
 0x335   :  { %1451 = vmatpush1.bf16.msra.mxu0 %v3567_v57  ;;  %1492 = vmatpush1.bf16.msra.mxu1 %v3572_v58 }
 0x336   :  { %1452 = vmatprep.subr.bf16.mxu0 %v3581_v59  ;;  %1493 = vmatprep.subr.bf16.mxu1 %v3586_v60 }
 0x339   :  { %1453 = vmatpush1.bf16.msra.mxu0 %v3591_v61  ;;  %1494 = vmatpush1.bf16.msra.mxu1 %v3596_v63 }
 0x33a   :  { %1454 = vmatprep.subr.bf16.mxu0 %v3605_v33  ;;  %1495 = vmatprep.subr.bf16.mxu1 %v3610_v34 }
 0x33d   :  { %1455 = vmatpush1.bf16.msra.mxu0 %v3615_v35  ;;  %1496 = vmatpush1.bf16.msra.mxu1 %v3620_v37 }
 0x33e   :  { %1456 = vmatprep.subr.bf16.mxu0 %v3629_v38  ;;  %1497 = vmatprep.subr.bf16.mxu1 %v3634_v39 }
 0x341   :  { %1457 = vmatpush1.bf16.msra.mxu0 %v3639_v40  ;;  %1498 = vmatpush1.bf16.msra.mxu1 %v3644_v42 }
 0x342   :  { %1458 = vmatprep.subr.bf16.mxu0 %v3653_v43  ;;  %1499 = vmatprep.subr.bf16.mxu1 %v3658_v2 }
 0x345   :  { %1459 = vmatpush1.bf16.msra.mxu0 %v3663_v3  ;;  %1500 = vmatpush1.bf16.msra.mxu1 %v3668_v5 }
 0x346   :  { %1460 = vmatprep.subr.bf16.mxu0 %v3677_v6  ;;  %1501 = vmatprep.subr.bf16.mxu1 %v3682_v7 }
 0x349   :  { %1461 = vmatpush1.bf16.msra.mxu0 %v3687_v8  ;;  %1502 = vmatpush1.bf16.msra.mxu1 %v3692_v9 }
 0x34a   :  { %1754 = vmatprep.subr.bf16.mxu0 %v3509_v4  ;;  %1795 = vmatprep.subr.bf16.mxu1 %v3514_v48 }
 0x3fe   :  { %v1172_v12 = vpop.f32.mrb[12].mxu0  ;;  %v1213_v13 = vpop.f32.mrb[12].mxu1 }
 0x3ff   :  { %v1220_v14 = vadd.f32 %v2748_v10, %v1172_v12  ;;  %v1174_v15 = vpop.f32.mrb[13].mxu0  ;;  %v1215_v16 = vpop.f32.mrb[13].mxu1  ;;  %v1222_v25 = vadd.f32 %v2750_v17, %v1213_v13  ;;  %v3131_v13 = vmov 1983009808  }
 0x400   :  { %v1221_v18 = vadd.f32 %v2749_v11, %v1174_v15  ;;  %v1176_v19 = vpop.f32.mrb[14].mxu0  ;;  %v1217_v20 = vpop.f32.mrb[14].mxu1  ;;  %v1223_v27 = vadd.f32 %v2751_v26, %v1215_v16  ;;  %v2493_v15 = vlaneseq }
 0x401   :  { %v1224_v21 = vmul.f32 0.5, %v1220_v14  ;;  %v1177_v22 = vpop.f32.mrb[15].mxu0  ;;  %v1218_v23 = vpop.f32.mrb[15].mxu1  ;;  %v2491_v14 = vunpack.c.l.s4 %v3131_v13 }
 0x402   :  { %v1228_v24 = vmul.f32 0.5, %v1221_v18  ;;  %v1233_v28 = vmul.f32 0.5, %v1223_v27  ;;  %v3716_v18 = vshrl.u32 %v2493_v15, 7 }
 0x403   :  { %3080 = vtanh.f32 %v1224_v21  ;;  %v2492_v17 = vunpack.c.0.s8 %v2491_v14  ;;  %v2488_v21 = vcombine.low %v3394_v36, %v3500_v46  ;;  %v2786_v14 = vld [vmem:[%s3946_s0 + $0x90] sm:$0xff] }
 0x404   :  { %3082 = vtanh.f32 %v1228_v24 }
 0x405   :  { %3084 = vtanh.f32 %v1222_v25  ;;  %v3723_v22 = vsub.s32 %v2492_v17, %v3716_v18 }
 0x406   :  { %3086 = vtanh.f32 %v1233_v28 }
 0x407   :  { %v3728_v27 = vrot.slane %v2488_v21, %v3723_v22 }
 0x40d   :  { %v3081_v29 = vpop.eup %3080 }
 0x40e   :  { %v3083_v30 = vpop.eup %3082  ;;  %v1226_v32 = vmul.f32 0.5, %v3081_v29 }
 0x40f   :  { %v1230_v62 = vmul.f32 0.5, %v3083_v30  ;;  %v3085_v45 = vpop.eup %3084 }
 0x410   :  { %v1227_v44 = vadd.f32 0.5, %v1226_v32  ;;  %v3087_v12 = vpop.eup %3086 }
 0x411   :  { %v1231_v0 = vadd.f32 0.5, %v1230_v62  ;;  %v1235_v16 = vmul.f32 0.5, %v3087_v12 }
 0x412   :  { %v1239_v47 = vmul.f32 %v3085_v45, %v1227_v44  ;;  %v2784_v44 = vld [vmem:[%s3946_s0 + $0x80] sm:$0xff]  ;;  %v2785_v45 = vld [vmem:[%s3946_s0 + $0x88] sm:$0xff] }
 0x413   :  { %v1238_v10 = vmul.f32 %v1231_v0, %v3497_v31  ;;  %v1236_v19 = vadd.f32 0.5, %v1235_v16  ;;  %v2489_v31 = vcombine.high %v3394_v36, %v3500_v46 }
 0x415   :  { %v3713_v11 = vadd.f32 %v1239_v47, %v1238_v10  ;;  %v3731_v28 = vrot.slane %v2489_v31, %v3723_v22 }
 0x417   :  { %3088 = vtanh.f32 %v3713_v11 }
 0x421   :  { %v3089_v20 = vpop.eup %3088 }
 0x422   :  { %v1242_v23 = vmul.f32 %v3089_v20, %v1236_v19 }
 0x424   :  { %v1244_v24 = vpack.c.bf16 %v1242_v23, %v1242_v23  ;;  %v2504_v25 = vcombine.low %v3448_v41, %v1242_v23  ;;  %v2505_v26 = vcombine.high %v3448_v41, %v1242_v23 }
 0x426   :  { %1245 = vst [vmem:[#allocation2] sm:$0xf] %v1244_v24  ;;  %v3734_v29 = vrot.slane %v2504_v25, %v3723_v22  ;;  %v3737_v36 = vrot.slane %v2505_v26, %v3723_v22  ;;  %v2787_v24 = vld [vmem:[%s3946_s0 + $0x98] sm:$0xff] }
 0x428   :  { %v2552_v46 = vcombine.low %v3728_v27, %v3734_v29  ;;  %v2553_v30 = vcombine.high %v3728_v27, %v3734_v29  ;;  %v2568_v41 = vcombine.low %v3731_v28, %v3737_v36  ;;  %v2569_v32 = vcombine.high %v3731_v28, %v3737_v36 }
 0x42d   :  { %v1253_v62 = vld [vmem:[#allocation2] sm:$0xf] }
 0x42e   :  { %1479 = vmatmul.mubr.bf16.vlgmr.msra.gmra.mrb[16].mxu0 %v1253_v62  ;;  %1520 = vmatmul.mubr.bf16.vlgmr.msra.gmra.mrb[16].mxu1 %v1253_v62 }
 0x42f   :  { %1755 = vmatpush1.bf16.msra.mxu0 %v3519_v49  ;;  %1796 = vmatpush1.bf16.msra.mxu1 %v3524_v50 }
 0x430   :  { %1756 = vmatprep.subr.bf16.mxu0 %v3533_v51  ;;  %1797 = vmatprep.subr.bf16.mxu1 %v3538_v52 }
 0x431   :  { %1786 = vmatprep.mubr.bf16.mxu0 %v3130_v1  ;;  %1827 = vmatprep.mubr.bf16.mxu1 %v3130_v1 }
 0x433   :  { %1757 = vmatpush1.bf16.msra.mxu0 %v3543_v53  ;;  %1798 = vmatpush1.bf16.msra.mxu1 %v3548_v54 }
 0x434   :  { %1758 = vmatprep.subr.bf16.mxu0 %v3557_v55  ;;  %1799 = vmatprep.subr.bf16.mxu1 %v3562_v56 }
 0x437   :  { %1759 = vmatpush1.bf16.msra.mxu0 %v3567_v57  ;;  %1800 = vmatpush1.bf16.msra.mxu1 %v3572_v58 }
 0x438   :  { %1760 = vmatprep.subr.bf16.mxu0 %v3581_v59  ;;  %1801 = vmatprep.subr.bf16.mxu1 %v3586_v60 }
 0x43b   :  { %1761 = vmatpush1.bf16.msra.mxu0 %v3591_v61  ;;  %1802 = vmatpush1.bf16.msra.mxu1 %v3596_v63 }
 0x43c   :  { %1762 = vmatprep.subr.bf16.mxu0 %v3605_v33  ;;  %1803 = vmatprep.subr.bf16.mxu1 %v3610_v34 }
 0x43f   :  { %1763 = vmatpush1.bf16.msra.mxu0 %v3615_v35  ;;  %1804 = vmatpush1.bf16.msra.mxu1 %v3620_v37 }
 0x440   :  { %1764 = vmatprep.subr.bf16.mxu0 %v3629_v38  ;;  %1805 = vmatprep.subr.bf16.mxu1 %v3634_v39 }
 0x443   :  { %1765 = vmatpush1.bf16.msra.mxu0 %v3639_v40  ;;  %1806 = vmatpush1.bf16.msra.mxu1 %v3644_v42 }
 0x444   :  { %1766 = vmatprep.subr.bf16.mxu0 %v3653_v43  ;;  %1807 = vmatprep.subr.bf16.mxu1 %v3658_v2 }
 0x447   :  { %1767 = vmatpush1.bf16.msra.mxu0 %v3663_v3  ;;  %1808 = vmatpush1.bf16.msra.mxu1 %v3668_v5 }
 0x448   :  { %1768 = vmatprep.subr.bf16.mxu0 %v3677_v6  ;;  %1809 = vmatprep.subr.bf16.mxu1 %v3682_v7 }
 0x44b   :  { %1769 = vmatpush1.bf16.msra.mxu0 %v3687_v8  ;;  %1810 = vmatpush1.bf16.msra.mxu1 %v3692_v9 }
 0x44c   :  { %2062 = vmatprep.subr.bf16.mxu0 %v3509_v4  ;;  %2103 = vmatprep.subr.bf16.mxu1 %v3514_v48 }
 0x501   :  { %v1480_v0 = vpop.f32.mrb[16].mxu0  ;;  %v1521_v47 = vpop.f32.mrb[16].mxu1 }
 0x502   :  { %v1528_v10 = vadd.f32 %v2784_v44, %v1480_v0  ;;  %v1482_v12 = vpop.f32.mrb[17].mxu0  ;;  %v1523_v13 = vpop.f32.mrb[17].mxu1  ;;  %v1530_v23 = vadd.f32 %v2786_v14, %v1521_v47 }
 0x503   :  { %v1529_v15 = vadd.f32 %v2785_v45, %v1482_v12  ;;  %v1484_v16 = vpop.f32.mrb[18].mxu0  ;;  %v1525_v17 = vpop.f32.mrb[18].mxu1  ;;  %v1531_v25 = vadd.f32 %v2787_v24, %v1523_v13  ;;  %v2821_v24 = vld [vmem:[%s3946_s0 + $0xa8] sm:$0xff] }
 0x504   :  { %v1532_v19 = vmul.f32 0.5, %v1528_v10  ;;  %v1485_v20 = vpop.f32.mrb[19].mxu0  ;;  %v1526_v21 = vpop.f32.mrb[19].mxu1 }
 0x505   :  { %v1536_v31 = vmul.f32 0.5, %v1529_v15  ;;  %v1541_v26 = vmul.f32 0.5, %v1531_v25 }
 0x506   :  { %3090 = vtanh.f32 %v1532_v19 }
 0x507   :  { %3092 = vtanh.f32 %v1536_v31 }
 0x508   :  { %3094 = vtanh.f32 %v1530_v23 }
 0x509   :  { %3096 = vtanh.f32 %v1541_v26 }
 0x510   :  { %v3091_v62 = vpop.eup %3090 }
 0x511   :  { %v3093_v44 = vpop.eup %3092  ;;  %v1534_v0 = vmul.f32 0.5, %v3091_v62 }
 0x512   :  { %v1538_v45 = vmul.f32 0.5, %v3093_v44  ;;  %v3095_v10 = vpop.eup %3094 }
 0x513   :  { %v1535_v12 = vadd.f32 0.5, %v1534_v0  ;;  %v3097_v14 = vpop.eup %3096 }
 0x514   :  { %v1539_v16 = vadd.f32 0.5, %v1538_v45  ;;  %v1543_v19 = vmul.f32 0.5, %v3097_v14  ;;  %v2822_v45 = vld [vmem:[%s3946_s0 + $0xb0] sm:$0xff] }
 0x515   :  { %v1547_v17 = vmul.f32 %v3095_v10, %v1535_v12 }
 0x516   :  { %v1546_v15 = vmul.f32 %v1539_v16, %v3713_v11  ;;  %v1544_v20 = vadd.f32 0.5, %v1543_v19  ;;  %v2820_v11 = vld [vmem:[%s3946_s0 + $0xa0] sm:$0xff]  ;;  %v2823_v19 = vld [vmem:[%s3946_s0 + $0xb8] sm:$0xff] }
 0x518   :  { %v3794_v47 = vadd.f32 %v1547_v17, %v1546_v15 }
 0x51a   :  { %3098 = vtanh.f32 %v3794_v47 }
 0x524   :  { %v3099_v13 = vpop.eup %3098 }
 0x525   :  { %v3797_v21 = vmul.f32 %v3099_v13, %v1544_v20 }
 0x527   :  { %v1552_v31 = vpack.c.bf16 %v3797_v21, %v3797_v21 }
 0x529   :  { %1553 = vst [vmem:[#allocation2] sm:$0xf] %v1552_v31 }
 0x530   :  { %v1561_v23 = vld [vmem:[#allocation2] sm:$0xf] }
 0x531   :  { %1787 = vmatmul.mubr.bf16.vlgmr.msra.gmra.mrb[20].mxu0 %v1561_v23  ;;  %1828 = vmatmul.mubr.bf16.vlgmr.msra.gmra.mrb[20].mxu1 %v1561_v23 }
 0x532   :  { %2063 = vmatpush1.bf16.msra.mxu0 %v3519_v49  ;;  %2104 = vmatpush1.bf16.msra.mxu1 %v3524_v50 }
 0x533   :  { %2064 = vmatprep.subr.bf16.mxu0 %v3533_v51  ;;  %2105 = vmatprep.subr.bf16.mxu1 %v3538_v52 }
 0x534   :  { %2094 = vmatprep.mubr.bf16.mxu0 %v3130_v1  ;;  %2135 = vmatprep.mubr.bf16.mxu1 %v3130_v1 }
 0x536   :  { %2065 = vmatpush1.bf16.msra.mxu0 %v3543_v53  ;;  %2106 = vmatpush1.bf16.msra.mxu1 %v3548_v54 }
 0x537   :  { %2066 = vmatprep.subr.bf16.mxu0 %v3557_v55  ;;  %2107 = vmatprep.subr.bf16.mxu1 %v3562_v56 }
 0x53a   :  { %2067 = vmatpush1.bf16.msra.mxu0 %v3567_v57  ;;  %2108 = vmatpush1.bf16.msra.mxu1 %v3572_v58 }
 0x53b   :  { %2068 = vmatprep.subr.bf16.mxu0 %v3581_v59  ;;  %2109 = vmatprep.subr.bf16.mxu1 %v3586_v60 }
 0x53e   :  { %2069 = vmatpush1.bf16.msra.mxu0 %v3591_v61  ;;  %2110 = vmatpush1.bf16.msra.mxu1 %v3596_v63 }
 0x53f   :  { %2070 = vmatprep.subr.bf16.mxu0 %v3605_v33  ;;  %2111 = vmatprep.subr.bf16.mxu1 %v3610_v34 }
 0x542   :  { %2071 = vmatpush1.bf16.msra.mxu0 %v3615_v35  ;;  %2112 = vmatpush1.bf16.msra.mxu1 %v3620_v37 }
 0x543   :  { %2072 = vmatprep.subr.bf16.mxu0 %v3629_v38  ;;  %2113 = vmatprep.subr.bf16.mxu1 %v3634_v39 }
 0x546   :  { %2073 = vmatpush1.bf16.msra.mxu0 %v3639_v40  ;;  %2114 = vmatpush1.bf16.msra.mxu1 %v3644_v42 }
 0x547   :  { %2074 = vmatprep.subr.bf16.mxu0 %v3653_v43  ;;  %2115 = vmatprep.subr.bf16.mxu1 %v3658_v2 }
 0x54a   :  { %2075 = vmatpush1.bf16.msra.mxu0 %v3663_v3  ;;  %2116 = vmatpush1.bf16.msra.mxu1 %v3668_v5 }
 0x54b   :  { %2076 = vmatprep.subr.bf16.mxu0 %v3677_v6  ;;  %2117 = vmatprep.subr.bf16.mxu1 %v3682_v7 }
 0x54e   :  { %2077 = vmatpush1.bf16.msra.mxu0 %v3687_v8  ;;  %2118 = vmatpush1.bf16.msra.mxu1 %v3692_v9 }
 0x54f   :  { %2370 = vmatprep.subr.bf16.mxu0 %v3509_v4  ;;  %2411 = vmatprep.subr.bf16.mxu1 %v3514_v48 }
 0x604   :  { %v1788_v25 = vpop.f32.mrb[20].mxu0  ;;  %v1829_v26 = vpop.f32.mrb[20].mxu1 }
 0x605   :  { %v1836_v62 = vadd.f32 %v2820_v11, %v1788_v25  ;;  %v1790_v44 = vpop.f32.mrb[21].mxu0  ;;  %v1831_v0 = vpop.f32.mrb[21].mxu1  ;;  %v1838_v14 = vadd.f32 %v2822_v45, %v1829_v26 }
 0x606   :  { %v1837_v4 = vadd.f32 %v2821_v24, %v1790_v44  ;;  %v1792_v12 = vpop.f32.mrb[22].mxu0  ;;  %v1833_v48 = vpop.f32.mrb[22].mxu1  ;;  %v1839_v20 = vadd.f32 %v2823_v19, %v1831_v0 }
 0x607   :  { %v1840_v10 = vmul.f32 0.5, %v1836_v62  ;;  %v1793_v16 = vpop.f32.mrb[23].mxu0  ;;  %v1834_v17 = vpop.f32.mrb[23].mxu1 }
 0x608   :  { %v1844_v15 = vmul.f32 0.5, %v1837_v4  ;;  %v1849_v13 = vmul.f32 0.5, %v1839_v20 }
 0x609   :  { %3100 = vtanh.f32 %v1840_v10 }
 0x60a   :  { %3102 = vtanh.f32 %v1844_v15 }
 0x60b   :  { %3104 = vtanh.f32 %v1838_v14 }
 0x60c   :  { %3106 = vtanh.f32 %v1849_v13 }
 0x613   :  { %v3101_v31 = vpop.eup %3100 }
 0x614   :  { %v3103_v23 = vpop.eup %3102  ;;  %v1842_v11 = vmul.f32 0.5, %v3101_v31  ;;  %v2892_v31 = vld [vmem:[%s3946_s0 + $0xe0] sm:$0xff] }
 0x615   :  { %v1846_v24 = vmul.f32 0.5, %v3103_v23  ;;  %v3105_v62 = vpop.eup %3104  ;;  %v2893_v23 = vld [vmem:[%s3946_s0 + $0xe8] sm:$0xff] }
 0x616   :  { %v1843_v25 = vadd.f32 0.5, %v1842_v11  ;;  %v3107_v45 = vpop.eup %3106 }
 0x617   :  { %v1847_v44 = vadd.f32 0.5, %v1846_v24  ;;  %v1851_v48 = vmul.f32 0.5, %v3107_v45 }
 0x618   :  { %v1855_v12 = vmul.f32 %v3105_v62, %v1843_v25 }
 0x619   :  { %v1854_v4 = vmul.f32 %v1847_v44, %v3794_v47  ;;  %v1852_v10 = vadd.f32 0.5, %v1851_v48 }
 0x61b   :  { %v3848_v26 = vadd.f32 %v1855_v12, %v1854_v4  ;;  %v2894_v12 = vld [vmem:[%s3946_s0 + $0xf0] sm:$0xff] }
 0x61d   :  { %3108 = vtanh.f32 %v3848_v26 }
 0x627   :  { %v3109_v0 = vpop.eup %3108 }
 0x628   :  { %v3851_v16 = vmul.f32 %v3109_v0, %v1852_v10 }
 0x62a   :  { %v1860_v17 = vpack.c.bf16 %v3851_v16, %v3851_v16 }
 0x62c   :  { %1861 = vst [vmem:[#allocation2] sm:$0xf] %v1860_v17 }
 0x633   :  { %v1869_v15 = vld [vmem:[#allocation2] sm:$0xf] }
 0x634   :  { %2095 = vmatmul.mubr.bf16.vlgmr.msra.gmra.mrb[24].mxu0 %v1869_v15  ;;  %2136 = vmatmul.mubr.bf16.vlgmr.msra.gmra.mrb[24].mxu1 %v1869_v15 }
 0x635   :  { %2371 = vmatpush1.bf16.msra.mxu0 %v3519_v49  ;;  %2412 = vmatpush1.bf16.msra.mxu1 %v3524_v50  ;;  %v2857_v49 = vld [vmem:[%s3946_s0 + $0xc8] sm:$0xff] }
 0x636   :  { %2372 = vmatprep.subr.bf16.mxu0 %v3533_v51  ;;  %2413 = vmatprep.subr.bf16.mxu1 %v3538_v52 }
 0x637   :  { %2402 = vmatprep.mubr.bf16.mxu0 %v3130_v1  ;;  %2443 = vmatprep.mubr.bf16.mxu1 %v3130_v1  ;;  %v2856_v1 = vld [vmem:[%s3946_s0 + $0xc0] sm:$0xff] }
 0x639   :  { %2373 = vmatpush1.bf16.msra.mxu0 %v3543_v53  ;;  %2414 = vmatpush1.bf16.msra.mxu1 %v3548_v54 }
 0x63a   :  { %2374 = vmatprep.subr.bf16.mxu0 %v3557_v55  ;;  %2415 = vmatprep.subr.bf16.mxu1 %v3562_v56  ;;  %v2858_v55 = vld [vmem:[%s3946_s0 + $0xd0] sm:$0xff] }
 0x63d   :  { %2375 = vmatpush1.bf16.msra.mxu0 %v3567_v57  ;;  %2416 = vmatpush1.bf16.msra.mxu1 %v3572_v58 }
 0x63e   :  { %2376 = vmatprep.subr.bf16.mxu0 %v3581_v59  ;;  %2417 = vmatprep.subr.bf16.mxu1 %v3586_v60 }
 0x641   :  { %2377 = vmatpush1.bf16.msra.mxu0 %v3591_v61  ;;  %2418 = vmatpush1.bf16.msra.mxu1 %v3596_v63 }
 0x642   :  { %2378 = vmatprep.subr.bf16.mxu0 %v3605_v33  ;;  %2419 = vmatprep.subr.bf16.mxu1 %v3610_v34  ;;  %v2859_v34 = vld [vmem:[%s3946_s0 + $0xd8] sm:$0xff] }
 0x645   :  { %2379 = vmatpush1.bf16.msra.mxu0 %v3615_v35  ;;  %2420 = vmatpush1.bf16.msra.mxu1 %v3620_v37 }
 0x646   :  { %2380 = vmatprep.subr.bf16.mxu0 %v3629_v38  ;;  %2421 = vmatprep.subr.bf16.mxu1 %v3634_v39 }
 0x649   :  { %2381 = vmatpush1.bf16.msra.mxu0 %v3639_v40  ;;  %2422 = vmatpush1.bf16.msra.mxu1 %v3644_v42 }
 0x64a   :  { %2382 = vmatprep.subr.bf16.mxu0 %v3653_v43  ;;  %2423 = vmatprep.subr.bf16.mxu1 %v3658_v2 }
 0x64d   :  { %2383 = vmatpush1.bf16.msra.mxu0 %v3663_v3  ;;  %2424 = vmatpush1.bf16.msra.mxu1 %v3668_v5 }
 0x64e   :  { %2384 = vmatprep.subr.bf16.mxu0 %v3677_v6  ;;  %2425 = vmatprep.subr.bf16.mxu1 %v3682_v7 }
 0x651   :  { %2385 = vmatpush1.bf16.msra.mxu0 %v3687_v8  ;;  %2426 = vmatpush1.bf16.msra.mxu1 %v3692_v9 }
 0x707   :  { %v2096_v50 = vpop.f32.mrb[24].mxu0  ;;  %v2137_v51 = vpop.f32.mrb[24].mxu1 }
 0x708   :  { %v2144_v52 = vadd.f32 %v2856_v1, %v2096_v50  ;;  %v2098_v53 = vpop.f32.mrb[25].mxu0  ;;  %v2139_v54 = vpop.f32.mrb[25].mxu1  ;;  %v2146_v33 = vadd.f32 %v2858_v55, %v2137_v51  ;;  %v2895_v1 = vld [vmem:[%s3946_s0 + $0xf8] sm:$0xff] }
 0x709   :  { %v2145_v56 = vadd.f32 %v2857_v49, %v2098_v53  ;;  %v2100_v57 = vpop.f32.mrb[26].mxu0  ;;  %v2141_v58 = vpop.f32.mrb[26].mxu1  ;;  %v2147_v35 = vadd.f32 %v2859_v34, %v2139_v54 }
 0x70a   :  { %v2148_v59 = vmul.f32 0.5, %v2144_v52  ;;  %v2101_v60 = vpop.f32.mrb[27].mxu0  ;;  %v2142_v61 = vpop.f32.mrb[27].mxu1 }
 0x70b   :  { %v2152_v63 = vmul.f32 0.5, %v2145_v56  ;;  %v2157_v37 = vmul.f32 0.5, %v2147_v35 }
 0x70c   :  { %3110 = vtanh.f32 %v2148_v59 }
 0x70d   :  { %3112 = vtanh.f32 %v2152_v63 }
 0x70e   :  { %3114 = vtanh.f32 %v2146_v33  ;;  %v3132_v33 = vmov 1934713408  }
 0x70f   :  { %3116 = vtanh.f32 %v2157_v37  ;;  %v2555_v34 = vunpack.c.l.s4 %v3132_v33 }
 0x716   :  { %v3111_v38 = vpop.eup %3110 }
 0x717   :  { %v3113_v39 = vpop.eup %3112  ;;  %v2150_v40 = vmul.f32 0.5, %v3111_v38  ;;  %v2556_v38 = vunpack.c.0.s8 %v2555_v34 }
 0x718   :  { %v2154_v42 = vmul.f32 0.5, %v3113_v39  ;;  %v3115_v2 = vpop.eup %3114 }
 0x719   :  { %v2151_v43 = vadd.f32 0.5, %v2150_v40  ;;  %v3117_v8 = vpop.eup %3116 }
 0x71a   :  { %v2155_v3 = vadd.f32 0.5, %v2154_v42  ;;  %v2159_v9 = vmul.f32 0.5, %v3117_v8 }
 0x71b   :  { %v2163_v5 = vmul.f32 %v3115_v2, %v2151_v43 }
 0x71c   :  { %v2162_v6 = vmul.f32 %v2155_v3, %v3848_v26  ;;  %v2160_v47 = vadd.f32 0.5, %v2159_v9 }
 0x71e   :  { %v2164_v7 = vadd.f32 %v2163_v5, %v2162_v6  ;;  %v2559_v5 = vsub.s32 %v2556_v38, %v3716_v18 }
 0x720   :  { %3118 = vtanh.f32 %v2164_v7  ;;  %v2567_v18 = vrot.slane %v2553_v30, %v2559_v5 }
 0x72a   :  { %v3119_v14 = vpop.eup %3118 }
 0x72b   :  { %v2166_v19 = vmul.f32 %v3119_v14, %v2160_v47 }
 0x72d   :  { %v2168_v20 = vpack.c.bf16 %v2166_v19, %v2166_v19  ;;  %v2520_v39 = vcombine.low %v3797_v21, %v2166_v19  ;;  %v2521_v40 = vcombine.high %v3797_v21, %v2166_v19 }
 0x72f   :  { %2169 = vst [vmem:[#allocation2] sm:$0xf] %v2168_v20  ;;  %v2528_v6 = vrot.slane %v2520_v39, %v3723_v22  ;;  %v2560_v20 = vrot.slane %v2552_v46, %v2559_v5 }
 0x736   :  { %v2177_v13 = vld [vmem:[#allocation2] sm:$0xf] }
 0x737   :  { %2403 = vmatmul.mubr.bf16.vlgmr.msra.gmra.mrb[28].mxu0 %v2177_v13  ;;  %2444 = vmatmul.mubr.bf16.vlgmr.msra.gmra.mrb[28].mxu1 %v2177_v13 }
 0x80a   :  { %v2404_v11 = vpop.f32.mrb[28].mxu0  ;;  %v2445_v24 = vpop.f32.mrb[28].mxu1 }
 0x80b   :  { %v2452_v25 = vadd.f32 %v2892_v31, %v2404_v11  ;;  %v2406_v62 = vpop.f32.mrb[29].mxu0  ;;  %v2447_v44 = vpop.f32.mrb[29].mxu1  ;;  %v2454_v15 = vadd.f32 %v2894_v12, %v2445_v24  ;;  %v2583_v11 = vrot.slane %v2569_v32, %v2559_v5 }
 0x80c   :  { %v2453_v4 = vadd.f32 %v2893_v23, %v2406_v62  ;;  %v2408_v26 = vpop.f32.mrb[30].mxu0  ;;  %v2449_v45 = vpop.f32.mrb[30].mxu1  ;;  %v2455_v49 = vadd.f32 %v2895_v1, %v2447_v44 }
 0x80d   :  { %v2456_v48 = vmul.f32 0.5, %v2452_v25  ;;  %v2409_v10 = vpop.f32.mrb[31].mxu0  ;;  %v2450_v0 = vpop.f32.mrb[31].mxu1 }
 0x80e   :  { %v2460_v17 = vmul.f32 0.5, %v2453_v4  ;;  %v2465_v50 = vmul.f32 0.5, %v2455_v49 }
 0x80f   :  { %3120 = vtanh.f32 %v2456_v48 }
 0x810   :  { %3122 = vtanh.f32 %v2460_v17 }
 0x811   :  { %3124 = vtanh.f32 %v2454_v15 }
 0x812   :  { %3126 = vtanh.f32 %v2465_v50 }
 0x819   :  { %v3121_v51 = vpop.eup %3120 }
 0x81a   :  { %v3123_v52 = vpop.eup %3122  ;;  %v2458_v53 = vmul.f32 0.5, %v3121_v51 }
 0x81b   :  { %v2462_v54 = vmul.f32 0.5, %v3123_v52  ;;  %v3125_v56 = vpop.eup %3124 }
 0x81c   :  { %v2459_v55 = vadd.f32 0.5, %v2458_v53  ;;  %v3127_v61 = vpop.eup %3126 }
 0x81d   :  { %v2463_v57 = vadd.f32 0.5, %v2462_v54  ;;  %v2467_v63 = vmul.f32 0.5, %v3127_v61 }
 0x81e   :  { %v2471_v58 = vmul.f32 %v3125_v56, %v2459_v55 }
 0x81f   :  { %v2470_v59 = vmul.f32 %v2463_v57, %v2164_v7  ;;  %v2468_v35 = vadd.f32 0.5, %v2467_v63  ;;  %v2535_v7 = vrot.slane %v2521_v40, %v3723_v22 }
 0x821   :  { %v2472_v60 = vadd.f32 %v2471_v58, %v2470_v59 }
 0x823   :  { %3128 = vtanh.f32 %v2472_v60 }
 0x82d   :  { %v3129_v37 = vpop.eup %3128 }
 0x82e   :  { %v2474_v42 = vmul.f32 %v3129_v37, %v2468_v35 }
 0x830   :  { %v2476_v43 = vpack.c.bf16 %v2474_v42, %v2474_v42  ;;  %v2536_v2 = vcombine.low %v3851_v16, %v2474_v42  ;;  %v2537_v3 = vcombine.high %v3851_v16, %v2474_v42 }
 0x832   :  { %2477 = vst [vmem:[#allocation2] sm:$0xf] %v2476_v43  ;;  %v2544_v8 = vrot.slane %v2536_v2, %v3723_v22  ;;  %v2551_v9 = vrot.slane %v2537_v3, %v3723_v22  ;;  %v2576_v22 = vrot.slane %v2568_v41, %v2559_v5 }
 0x834   :  { %v2584_v47 = vcombine.low %v2528_v6, %v2544_v8  ;;  %v2585_v14 = vcombine.high %v2528_v6, %v2544_v8  ;;  %v2600_v21 = vcombine.low %v2535_v7, %v2551_v9  ;;  %v2601_v19 = vcombine.high %v2535_v7, %v2551_v9 }
 0x836   :  { %v2592_v16 = vrot.slane %v2584_v47, %v2559_v5  ;;  %v2599_v13 = vrot.slane %v2585_v14, %v2559_v5  ;;  %v2608_v31 = vrot.slane %v2600_v21, %v2559_v5  ;;  %v2615_v23 = vrot.slane %v2601_v19, %v2559_v5 }
 0x838   :  { %v2616_v24 = vcombine.low %v2560_v20, %v2592_v16  ;;  %v2617_v25 = vcombine.high %v2560_v20, %v2592_v16  ;;  %v2618_v62 = vcombine.low %v2567_v18, %v2599_v13  ;;  %v2619_v46 = vcombine.high %v2567_v18, %v2599_v13 }
 0x839   :  { %v2620_v44 = vcombine.low %v2576_v22, %v2608_v31  ;;  %v2621_v12 = vcombine.high %v2576_v22, %v2608_v31  ;;  %v2622_v27 = vcombine.low %v2583_v11, %v2615_v23  ;;  %v2623_v29 = vcombine.high %v2583_v11, %v2615_v23 }
 0x83a   :  { %v2931_v30 = vpack.c.bf16 %v2617_v25, %v2616_v24  ;;  %v2936_v4 = vpack.c.bf16 %v2619_v46, %v2618_v62 }
 0x83b   :  { %v2941_v26 = vpack.c.bf16 %v2621_v12, %v2620_v44  ;;  %v2946_v45 = vpack.c.bf16 %v2623_v29, %v2622_v27 }
 0x83c   :  { %2932 = vst [vmem:[%s3947_s2] sm:$0xff] %v2931_v30   ;;  %2948 = vst [vmem:[%s3947_s2 + $0x8] sm:$0xff] %v2936_v4  }
 0x83d   :  { %2949 = vst [vmem:[%s3947_s2 + $0x10] sm:$0xff] %v2941_v26   ;;  %2950 = vst [vmem:[%s3947_s2 + $0x18] sm:$0xff] %v2946_v45  }

</bundles_post_ra>
